<compile_context>
chip_gen: v7x
topology: tpu7x:2x2x1
jax: 0.10.0
libtpu: 0.0.40
codegen_flags: <defaults>
</compile_context>

<pallas_src>
import jax
import jax.numpy as jnp
import numpy as np
from jax import lax
from jax.experimental import pallas as pl
from jax.experimental.pallas import tpu as pltpu

BN_EPS = 1e-5
LANE = 128                       # channel dims padded to a multiple of the lane width
VMEM_LIMIT = 32 * 1024 * 1024    # explicit scoped-VMEM budget (safe on v5e/v6e/v7x)


def _round_up(v, m):
    return (v + m - 1) // m * m


# ----------------------------- Pallas kernels ------------------------------ #

def _make_conv3x3_stats_kernel(wp, rext_r, cin_p, store_off):
    """Stride-1 3x3 conv from a ring-padded, row-flattened image + BN stats.

    x_ref: (R_in, Cin_p) flattened padded input, one image.  Tap (dy, dx) is the row
    window starting at dy*wp + dx.  Output is written into the ring-padded layout of
    the *next* conv's input (zero ring, interior at row offset store_off = wp + 1).
    Garbage columns (flat col >= W) are zeroed via mask_ref so the stats stay exact.
    """
    shifts = [dy * wp + dx for dy in range(3) for dx in range(3)]

    def kernel(x_ref, w_ref, mask_ref, a_ref, s_ref, ss_ref):
        @pl.when(pl.program_id(0) == 0)
        def _():
            s_ref[...] = jnp.zeros_like(s_ref)
            ss_ref[...] = jnp.zeros_like(ss_ref)

        acc = jnp.zeros((rext_r, a_ref.shape[-1]), jnp.float32)
        for k, sh in enumerate(shifts):
            acc += jnp.dot(x_ref[sh:sh + rext_r, :],
                           w_ref[k * cin_p:(k + 1) * cin_p, :],
                           preferred_element_type=jnp.float32)
        acc = acc * mask_ref[...]                      # zero garbage cols / tail rows

        a_ref[...] = jnp.zeros(a_ref.shape, a_ref.dtype)
        a_ref[pl.ds(store_off, rext_r), :] = acc.astype(a_ref.dtype)

        s_ref[...] += jnp.sum(acc, axis=0, keepdims=True)
        ss_ref[...] += jnp.sum(acc * acc, axis=0, keepdims=True)

    return kernel


def _im2col_conv_stats_kernel(p_ref, w_ref, a_ref, s_ref, ss_ref):
    """Strided conv1 fallback: pre-built ring-padded patch rows -> single matmul.

    Ring/tail patch rows are all-zero and there is no bias, so stats need no masking.
    """
    @pl.when(pl.program_id(0) == 0)
    def _():
        s_ref[...] = jnp.zeros_like(s_ref)
        ss_ref[...] = jnp.zeros_like(ss_ref)

    a = jnp.dot(p_ref[...], w_ref[...], preferred_element_type=jnp.float32)
    a_ref[...] = a.astype(a_ref.dtype)
    s_ref[...] += jnp.sum(a, axis=0, keepdims=True)
    ss_ref[...] += jnp.sum(a * a, axis=0, keepdims=True)


def _make_conv2_fused_kernel(wp, rext_r, cp, proj):
    """BN1 affine + ReLU prologue (h1 never hits HBM) -> in-kernel 3x3 conv2
    (+ fused 1x1 projection matmul) + BN2 / BN_matching statistics."""
    shifts = [dy * wp + dx for dy in range(3) for dx in range(3)]

    def kernel(*refs):
        if proj:
            (a1_ref, sc1_ref, sh1_ref, ring_ref, mask_ref, w2_ref, xs_ref, wm_ref,
             a2_ref, am_ref, s2_ref, ss2_ref, sm_ref, ssm_ref) = refs
        else:
            (a1_ref, sc1_ref, sh1_ref, ring_ref, mask_ref, w2_ref,
             a2_ref, s2_ref, ss2_ref) = refs

        @pl.when(pl.program_id(0) == 0)
        def _():
            s2_ref[...] = jnp.zeros_like(s2_ref)
            ss2_ref[...] = jnp.zeros_like(ss2_ref)
            if proj:
                sm_ref[...] = jnp.zeros_like(sm_ref)
                ssm_ref[...] = jnp.zeros_like(ssm_ref)

        # BN1 (batch-stat affine) + ReLU; ring_ref re-zeros the padding ring so the
        # conv2 "padding=1" semantics hold (relu(shift1) != 0 at the ring otherwise).
        h1 = jnp.maximum(a1_ref[...].astype(jnp.float32) * sc1_ref[...] + sh1_ref[...], 0.0)
        h1 = (h1 * ring_ref[...]).astype(w2_ref.dtype)

        acc = jnp.zeros((rext_r, cp), jnp.float32)
        for k, sh in enumerate(shifts):
            acc += jnp.dot(h1[sh:sh + rext_r, :],
                           w2_ref[k * cp:(k + 1) * cp, :],
                           preferred_element_type=jnp.float32)
        a2_ref[...] = acc.astype(a2_ref.dtype)

        accm = acc * mask_ref[...]                     # mask garbage cols out of stats
        s2_ref[...] += jnp.sum(accm, axis=0, keepdims=True)
        ss2_ref[...] += jnp.sum(accm * accm, axis=0, keepdims=True)

        if proj:
            am = jnp.dot(xs_ref[...], wm_ref[...], preferred_element_type=jnp.float32)
            am_ref[...] = am.astype(am_ref.dtype)
            sm_ref[...] += jnp.sum(am, axis=0, keepdims=True)
            ssm_ref[...] += jnp.sum(am * am, axis=0, keepdims=True)

    return kernel


def _make_finalize_kernel(proj, skip_off=0, rext_r=0):
    """BN2 affine (+ BN_matching affine of the projection | identity skip) + add + ReLU."""
    def kernel(*refs):
        if proj:
            a2_ref, sc2_ref, sh2_ref, am_ref, scm_ref, shm_ref, o_ref = refs
            skip = am_ref[...].astype(jnp.float32) * scm_ref[...] + shm_ref[...]
        else:
            a2_ref, sc2_ref, sh2_ref, x_ref, o_ref = refs
            # Identity skip read straight from the padded, flattened input block.
            skip = x_ref[skip_off:skip_off + rext_r, :].astype(jnp.float32)
        y = a2_ref[...].astype(jnp.float32) * sc2_ref[...] + sh2_ref[...] + skip
        o_ref[...] = jnp.maximum(y, 0.0)

    return kernel


# ----------------------------- pallas_call helper --------------------------- #

def _pcall(kernel, n_grid, ins, outs, semantics):
    """Grid over the batch dim.  kind 'b' -> (None, R, C) per-image block indexed by the
    grid step; kind 'c' -> full array, constant block index (weights / stats / masks)."""
    def spec(a, kind):
        shape = tuple(a.shape)
        if kind == "b":
            return pl.BlockSpec((None,) + shape[1:],
                                lambda n: (n,) + (0,) * (len(shape) - 1))
        nd = len(shape)
        return pl.BlockSpec(shape, lambda n: (0,) * nd)

    in_specs = [spec(a, k) for a, k in ins]
    out_specs = [spec(o, k) for o, k in outs]
    out_shapes = [o for o, _ in outs]
    multi = len(outs) > 1

    res = pl.pallas_call(
        kernel,
        out_shape=tuple(out_shapes) if multi else out_shapes[0],
        grid=(n_grid,),
        in_specs=in_specs,
        out_specs=tuple(out_specs) if multi else out_specs[0],
        compiler_params=pltpu.CompilerParams(
            dimension_semantics=(semantics,),
            vmem_limit_bytes=VMEM_LIMIT),
    )(*[a for a, _ in ins])
    return res if multi else (res,)


# ------------------------------- glue (JAX) -------------------------------- #

def _row(v, cols):
    v = v.reshape(1, -1).astype(jnp.float32)
    return jnp.pad(v, ((0, 0), (0, cols - v.shape[1])))


def _bn_affine(s, ss, g, bt, count):
    """Fold batch sum / sum-of-squares into a per-channel affine (tiny host-side math)."""
    mean = s / count
    var = jnp.maximum(ss / count - mean * mean, 0.0)    # biased variance
    scale = g * lax.rsqrt(var + BN_EPS)
    return scale, bt - mean * scale


def resblock_forward(x_nchw, params, stride, *, matmul_dtype=jnp.bfloat16):
    """Pallas implementation of ResBlock.forward (PyTorch training-mode BatchNorm).

    Conv biases are omitted from the kernels: with batch-stat BN they cancel exactly.
    """
    N, Ci, H, W = x_nchw.shape
    Co = params["w1"].shape[0]
    s = stride
    H1 = (H - 1) // s + 1
    W1 = (W - 1) // s + 1
    Wp2 = W1 + 2                                # padded width of the conv2 input layout
    Rp2 = (H1 + 2) * Wp2                        # ring-padded flat rows (conv2 input)
    Rext = H1 * Wp2                             # conv output rows incl. 2 garbage cols
    Rext_r = _round_up(Rext, 8)
    R2_r = _round_up(max(Rp2, Rext_r + 2 * Wp2 + 2, Wp2 + 1 + Rext_r), 8)
    Cp = _round_up(Co, LANE)
    Cip = _round_up(Ci, LANE)

    x = jnp.transpose(x_nchw, (0, 2, 3, 1)).astype(jnp.float32)     # NHWC
    m1 = float(N * H1 * W1)

    # Static row masks (tiny, host-precomputed).
    r = np.arange(Rext_r)
    mask_valid = jnp.asarray(
        ((r < Rext) & (r % Wp2 < W1)).astype(np.float32).reshape(-1, 1))
    rr = np.arange(R2_r)
    hh, ww = rr // Wp2, rr % Wp2
    ring = jnp.asarray(
        ((rr < Rp2) & (hh >= 1) & (hh <= H1) & (ww >= 1) & (ww <= W1))
        .astype(np.float32).reshape(-1, 1))

    a1_shape = jax.ShapeDtypeStruct((N, R2_r, Cp), matmul_dtype)
    stat = jax.ShapeDtypeStruct((1, Cp), jnp.float32)

    # ---- Pass A: conv1 (no bias) + BN1 statistics, grid over batch ("arbitrary") ----
    xflat = None
    if s == 1:
        Wp1, Rp1 = W + 2, (H + 2) * (W + 2)
        R1_r = _round_up(max(Rp1 + 2, Rext_r + 2 * Wp1 + 2, Wp1 + 1 + Rext_r), 8)
        xp = jnp.pad(x, ((0, 0), (1, 1), (1, 1), (0, Cip - Ci)))
        xflat = jnp.pad(xp.reshape(N, Rp1, Cip),
                        ((0, 0), (0, R1_r - Rp1), (0, 0))).astype(matmul_dtype)
        w1 = jnp.pad(jnp.transpose(params["w1"], (2, 3, 1, 0)),
                     ((0, 0), (0, 0), (0, Cip - Ci), (0, Cp - Co)))
        w1 = w1.reshape(9 * Cip, Cp).astype(matmul_dtype)
        a1, s1, ss1 = _pcall(
            _make_conv3x3_stats_kernel(Wp1, Rext_r, Cip, Wp2 + 1), N,
            ins=[(xflat, "b"), (w1, "c"), (mask_valid, "c")],
            outs=[(a1_shape, "b"), (stat, "c"), (stat, "c")],
            semantics="arbitrary")
    else:
        # Strided conv1: bounded host im2col (expansion ~9/s^2 of x), ring-padded so the
        # kernel output lands directly in conv2's padded layout with a zero ring.
        xp = jnp.pad(x, ((0, 0), (1, 1), (1, 1), (0, 0)))
        cols = [xp[:, dy:dy + (H1 - 1) * s + 1:s, dx:dx + (W1 - 1) * s + 1:s, :]
                for dy in range(3) for dx in range(3)]
        patches = jnp.concatenate(cols, axis=-1)                    # (N, H1, W1, 9*Ci)
        Kp = _round_up(9 * Ci, LANE)
        patches = jnp.pad(patches, ((0, 0), (1, 1), (1, 1), (0, Kp - 9 * Ci)))
        patches = patches.reshape(N, Rp2, Kp)
        patches = jnp.pad(patches, ((0, 0), (0, R2_r - Rp2), (0, 0))).astype(matmul_dtype)
        w1 = jnp.transpose(params["w1"], (2, 3, 1, 0)).reshape(9 * Ci, Co)
        w1 = jnp.pad(w1, ((0, Kp - 9 * Ci), (0, Cp - Co))).astype(matmul_dtype)
        a1, s1, ss1 = _pcall(
            _im2col_conv_stats_kernel, N,
            ins=[(patches, "b"), (w1, "c")],
            outs=[(a1_shape, "b"), (stat, "c"), (stat, "c")],
            semantics="arbitrary")

    sc1, sh1 = _bn_affine(s1, ss1, _row(params["g1"], Cp), _row(params["bt1"], Cp), m1)

    # ---- Pass B: BN1+ReLU prologue -> conv2 (+ fused 1x1 projection) + stats ----
    w2 = jnp.pad(jnp.transpose(params["w2"], (2, 3, 1, 0)),
                 ((0, 0), (0, 0), (0, Cp - Co), (0, Cp - Co)))
    w2 = w2.reshape(9 * Cp, Cp).astype(matmul_dtype)
    proj = (s != 1) or (Ci != Co)
    a2_shape = jax.ShapeDtypeStruct((N, Rext_r, Cp), matmul_dtype)
    kern_b = _make_conv2_fused_kernel(Wp2, Rext_r, Cp, proj)

    if proj:
        xs = x[:, ::s, ::s, :]                                      # (N, H1, W1, Ci)
        xs = jnp.pad(xs, ((0, 0), (0, 0), (0, Wp2 - W1), (0, Cip - Ci)))
        xs = xs.reshape(N, Rext, Cip)
        xs = jnp.pad(xs, ((0, 0), (0, Rext_r - Rext), (0, 0))).astype(matmul_dtype)
        wm = jnp.pad(jnp.transpose(params["wm"][:, :, 0, 0], (1, 0)),
                     ((0, Cip - Ci), (0, Cp - Co))).astype(matmul_dtype)

        a2, am, s2, ss2, sm, ssm = _pcall(
            kern_b, N,
            ins=[(a1, "b"), (sc1, "c"), (sh1, "c"), (ring, "c"), (mask_valid, "c"),
                 (w2, "c"), (xs, "b"), (wm, "c")],
            outs=[(a2_shape, "b"), (a2_shape, "b"),
                  (stat, "c"), (stat, "c"), (stat, "c"), (stat, "c")],
            semantics="arbitrary")

        sc2, sh2 = _bn_affine(s2, ss2, _row(params["g2"], Cp), _row(params["bt2"], Cp), m1)
        scm, shm = _bn_affine(sm, ssm, _row(params["gm"], Cp), _row(params["btm"], Cp), m1)
        (out,) = _pcall(
            _make_finalize_kernel(True), N,
            ins=[(a2, "b"), (sc2, "c"), (sh2, "c"), (am, "b"), (scm, "c"), (shm, "c")],
            outs=[(jax.ShapeDtypeStruct((N, Rext_r, Cp), jnp.float32), "b")],
            semantics="parallel")
    else:
        a2, s2, ss2 = _pcall(
            kern_b, N,
            ins=[(a1, "b"), (sc1, "c"), (sh1, "c"), (ring, "c"), (mask_valid, "c"),
                 (w2, "c")],
            outs=[(a2_shape, "b"), (stat, "c"), (stat, "c")],
            semantics="arbitrary")

        sc2, sh2 = _bn_affine(s2, ss2, _row(params["g2"], Cp), _row(params["bt2"], Cp), m1)
        (out,) = _pcall(
            _make_finalize_kernel(False, skip_off=Wp2 + 1, rext_r=Rext_r), N,
            ins=[(a2, "b"), (sc2, "c"), (sh2, "c"), (xflat, "b")],
            outs=[(jax.ShapeDtypeStruct((N, Rext_r, Cp), jnp.float32), "b")],
            semantics="parallel")

    out = out[:, :Rext, :].reshape(N, H1, Wp2, Cp)[:, :, :W1, :Co]
    return jnp.transpose(out, (0, 3, 1, 2))            # back to NCHW


# --------------------------- pure-JAX reference ----------------------------- #

def _ref_conv(x, w, b, stride, pad):
    y = lax.conv_general_dilated(
        x, w, (stride, stride), [(pad, pad), (pad, pad)],
        dimension_numbers=("NCHW", "OIHW", "NCHW"),
        precision=lax.Precision.HIGHEST)
    return y + b.reshape(1, -1, 1, 1)


def _ref_bn(x, g, bt):
    mean = jnp.mean(x, axis=(0, 2, 3), keepdims=True)
    var = jnp.mean((x - mean) ** 2, axis=(0, 2, 3), keepdims=True)
    return (x - mean) * lax.rsqrt(var + BN_EPS) * g.reshape(1, -1, 1, 1) + bt.reshape(1, -1, 1, 1)


def resblock_reference(x, params, stride):
    in_c, out_c = x.shape[1], params["w1"].shape[0]
    h = jnp.maximum(_ref_bn(_ref_conv(x, params["w1"], params["b1"], stride, 1),
                            params["g1"], params["bt1"]), 0.0)
    h = _ref_bn(_ref_conv(h, params["w2"], params["b2"], 1, 1), params["g2"], params["bt2"])
    if stride != 1 or in_c != out_c:
        skip = _ref_bn(_ref_conv(x, params["wm"], params["bm"], stride, 0),
                       params["gm"], params["btm"])
    else:
        skip = x
    return jnp.maximum(h + skip, 0.0)


# ---------------------------------- main ------------------------------------ #

def make_params(key, in_c, out_c):
    ks = jax.random.split(key, 6)
    return {
        "w1": 0.1 * jax.random.normal(ks[0], (out_c, in_c, 3, 3), jnp.float32),
        "b1": 0.05 * jax.random.normal(ks[1], (out_c,), jnp.float32),
        "g1": jnp.ones((out_c,), jnp.float32), "bt1": jnp.zeros((out_c,), jnp.float32),
        "w2": 0.1 * jax.random.normal(ks[2], (out_c, out_c, 3, 3), jnp.float32),
        "b2": 0.05 * jax.random.normal(ks[3], (out_c,), jnp.float32),
        "g2": jnp.ones((out_c,), jnp.float32), "bt2": jnp.zeros((out_c,), jnp.float32),
        "wm": 0.1 * jax.random.normal(ks[4], (out_c, in_c, 1, 1), jnp.float32),
        "bm": 0.05 * jax.random.normal(ks[5], (out_c,), jnp.float32),
        "gm": jnp.ones((out_c,), jnp.float32), "btm": jnp.zeros((out_c,), jnp.float32),
    }


if __name__ == "__main__":
    key = jax.random.PRNGKey(0)
    kx, kp1, kp2 = jax.random.split(key, 3)

    fwd = jax.jit(resblock_forward, static_argnames=("stride", "matmul_dtype"))

    # Case 1: projection skip (in=4, out=8, stride=2) -> strided-conv1 im2col path.
    x1 = jax.random.normal(kx, (2, 4, 16, 16), jnp.float32)
    params1 = make_params(kp1, 4, 8)
    r1 = np.asarray(resblock_reference(x1, params1, 2))
    y1f = np.asarray(jax.block_until_ready(
        fwd(x1, params1, stride=2, matmul_dtype=jnp.float32)))
    np.testing.assert_allclose(y1f, r1, rtol=2e-3, atol=2e-3)
    y1 = np.asarray(jax.block_until_ready(fwd(x1, params1, stride=2)))
    np.testing.assert_allclose(y1, r1, rtol=2e-2, atol=2e-2)
    assert y1.shape == (2, 8, 8, 8)

    # Case 2: identity skip (in=out=8, stride=1) -> fully in-kernel patch path.
    x2 = jax.random.normal(kx, (2, 8, 16, 16), jnp.float32)
    params2 = make_params(kp2, 8, 8)
    r2 = np.asarray(resblock_reference(x2, params2, 1))
    y2f = np.asarray(jax.block_until_ready(
        fwd(x2, params2, stride=1, matmul_dtype=jnp.float32)))
    np.testing.assert_allclose(y2f, r2, rtol=2e-3, atol=2e-3)
    y2 = np.asarray(jax.block_until_ready(fwd(x2, params2, stride=1)))
    np.testing.assert_allclose(y2, r2, rtol=2e-2, atol=2e-2)
    assert y2.shape == (2, 8, 16, 16)

    print("KERNEL_OK")
</pallas_src>

<mosaic_0001>
module attributes {stable_mosaic.version = 11 : i64} {
  func.func @_im2col_conv_stats_kernel(%arg0: i32, %arg1: memref<1x104x128xf32, #tpu.memory_space<vmem>>, %arg2: memref<128x128xf32, #tpu.memory_space<vmem>>, %arg3: memref<1x104x128xf32, #tpu.memory_space<vmem>>, %arg4: memref<1x128xf32, #tpu.memory_space<vmem>>, %arg5: memref<1x128xf32, #tpu.memory_space<vmem>>) attributes {dimension_semantics = [#tpu.dimension_semantics<arbitrary>], iteration_bounds = array<i64: 2>, scalar_prefetch = 0 : i64, scratch_operands = 0 : i64, tpu.core_type = #tpu.core_type<tc>, window_params = [{transform_indices = @transform_0, window_bounds = array<i64: 1, 104, 128>}, {pipeline_mode = #tpu.pipeline_mode<synchronous>, transform_indices = @transform_1, window_bounds = array<i64: 128, 128>}, {transform_indices = @transform_2, window_bounds = array<i64: 1, 104, 128>}, {pipeline_mode = #tpu.pipeline_mode<synchronous>, transform_indices = @transform_3, window_bounds = array<i64: 1, 128>}, {pipeline_mode = #tpu.pipeline_mode<synchronous>, transform_indices = @transform_4, window_bounds = array<i64: 1, 128>}]} {
    %c0_i32 = arith.constant 0 : i32
    %0 = arith.cmpi eq, %arg0, %c0_i32 : i32
    %1 = arith.extui %0 : i1 to i32
    %c0_i32_0 = arith.constant 0 : i32
    %2 = arith.cmpi ne, %1, %c0_i32_0 : i32
    scf.if %2 {
      %cst_18 = arith.constant 0.000000e+00 : f32
      %21 = vector.broadcast %cst_18 : f32 to vector<1x128xf32>
      %c0_19 = arith.constant 0 : index
      %c0_20 = arith.constant 0 : index
      %22 = vector.load %arg4[%c0_19, %c0_20] : memref<1x128xf32, #tpu.memory_space<vmem>>, vector<1x128xf32>
      tpu.vector_store %arg4[%c0_19, %c0_20], %21 {strides = array<i32>} : memref<1x128xf32, #tpu.memory_space<vmem>>, vector<1x128xf32>,
      %cst_21 = arith.constant 0.000000e+00 : f32
      %23 = vector.broadcast %cst_21 : f32 to vector<1x128xf32>
      %c0_22 = arith.constant 0 : index
      %c0_23 = arith.constant 0 : index
      %24 = vector.load %arg5[%c0_22, %c0_23] : memref<1x128xf32, #tpu.memory_space<vmem>>, vector<1x128xf32>
      tpu.vector_store %arg5[%c0_22, %c0_23], %23 {strides = array<i32>} : memref<1x128xf32, #tpu.memory_space<vmem>>, vector<1x128xf32>,
    } else {
    }
    %c0 = arith.constant 0 : index
    %c0_1 = arith.constant 0 : index
    %c0_2 = arith.constant 0 : index
    %3 = vector.load %arg1[%c0, %c0_1, %c0_2] : memref<1x104x128xf32, #tpu.memory_space<vmem>>, vector<1x104x128xf32>
    %4 = vector.shape_cast %3 : vector<1x104x128xf32> to vector<104x128xf32>
    %c0_3 = arith.constant 0 : index
    %c0_4 = arith.constant 0 : index
    %5 = vector.load %arg2[%c0_3, %c0_4] : memref<128x128xf32, #tpu.memory_space<vmem>>, vector<128x128xf32>
    %cst = arith.constant dense<0.000000e+00> : vector<104x128xf32>
    %6 = tpu.matmul %4, %5, %cst {dimension_numbers = #tpu.dot_dimension_numbers<[1], [0], [0], [1], [0, 0, 1, 1], [], []>} : vector<104x128xf32>, vector<128x128xf32>, vector<104x128xf32> -> vector<104x128xf32>
    %c0_5 = arith.constant 0 : index
    %c0_6 = arith.constant 0 : index
    %c0_7 = arith.constant 0 : index
    %7 = vector.load %arg3[%c0_5, %c0_6, %c0_7] : memref<1x104x128xf32, #tpu.memory_space<vmem>>, vector<1x104x128xf32>
    %8 = vector.shape_cast %7 : vector<1x104x128xf32> to vector<104x128xf32>
    %9 = vector.shape_cast %6 : vector<104x128xf32> to vector<1x104x128xf32>
    tpu.vector_store %arg3[%c0_5, %c0_6, %c0_7], %9 {strides = array<i32>} : memref<1x104x128xf32, #tpu.memory_space<vmem>>, vector<1x104x128xf32>,
    %c0_8 = arith.constant 0 : index
    %c0_9 = arith.constant 0 : index
    %10 = vector.load %arg4[%c0_8, %c0_9] : memref<1x128xf32, #tpu.memory_space<vmem>>, vector<1x128xf32>
    %cst_10 = arith.constant dense<0.000000e+00> : vector<128xf32>
    %11 = vector.multi_reduction <add>, %6, %cst_10 [0] : vector<104x128xf32> to vector<128xf32>
    %12 = vector.shape_cast %11 : vector<128xf32> to vector<1x128xf32>
    %13 = arith.addf %10, %12 : vector<1x128xf32>
    %c0_11 = arith.constant 0 : index
    %c0_12 = arith.constant 0 : index
    %14 = vector.load %arg4[%c0_11, %c0_12] : memref<1x128xf32, #tpu.memory_space<vmem>>, vector<1x128xf32>
    tpu.vector_store %arg4[%c0_11, %c0_12], %13 {strides = array<i32>} : memref<1x128xf32, #tpu.memory_space<vmem>>, vector<1x128xf32>,
    %c0_13 = arith.constant 0 : index
    %c0_14 = arith.constant 0 : index
    %15 = vector.load %arg5[%c0_13, %c0_14] : memref<1x128xf32, #tpu.memory_space<vmem>>, vector<1x128xf32>
    %16 = arith.mulf %6, %6 : vector<104x128xf32>
    %cst_15 = arith.constant dense<0.000000e+00> : vector<128xf32>
    %17 = vector.multi_reduction <add>, %16, %cst_15 [0] : vector<104x128xf32> to vector<128xf32>
    %18 = vector.shape_cast %17 : vector<128xf32> to vector<1x128xf32>
    %19 = arith.addf %15, %18 : vector<1x128xf32>
    %c0_16 = arith.constant 0 : index
    %c0_17 = arith.constant 0 : index
    %20 = vector.load %arg5[%c0_16, %c0_17] : memref<1x128xf32, #tpu.memory_space<vmem>>, vector<1x128xf32>
    tpu.vector_store %arg5[%c0_16, %c0_17], %19 {strides = array<i32>} : memref<1x128xf32, #tpu.memory_space<vmem>>, vector<1x128xf32>,
    return
  }
  func.func @transform_0(%arg0: i32) -> (i32, i32, i32) {
    %c0_i32 = arith.constant 0 : i32
    %c0_i32_0 = arith.constant 0 : i32
    %c0_i32_1 = arith.constant 0 : i32
    return %arg0, %c0_i32, %c0_i32_0 : i32, i32, i32
  }
  func.func @transform_1(%arg0: i32) -> (i32, i32) {
    %c0_i32 = arith.constant 0 : i32
    %c0_i32_0 = arith.constant 0 : i32
    %c0_i32_1 = arith.constant 0 : i32
    return %c0_i32, %c0_i32_0 : i32, i32
  }
  func.func @transform_2(%arg0: i32) -> (i32, i32, i32) {
    %c0_i32 = arith.constant 0 : i32
    %c0_i32_0 = arith.constant 0 : i32
    %c0_i32_1 = arith.constant 0 : i32
    return %arg0, %c0_i32, %c0_i32_0 : i32, i32, i32
  }
  func.func @transform_3(%arg0: i32) -> (i32, i32) {
    %c0_i32 = arith.constant 0 : i32
    %c0_i32_0 = arith.constant 0 : i32
    %c0_i32_1 = arith.constant 0 : i32
    return %c0_i32, %c0_i32_0 : i32, i32
  }
  func.func @transform_4(%arg0: i32) -> (i32, i32) {
    %c0_i32 = arith.constant 0 : i32
    %c0_i32_0 = arith.constant 0 : i32
    %c0_i32_1 = arith.constant 0 : i32
    return %c0_i32, %c0_i32_0 : i32, i32
  }
}

module attributes {stable_mosaic.version = 11 : i64} {
  func.func @kernel(%arg0: i32, %arg1: memref<1x104x128xf32, #tpu.memory_space<vmem>>, %arg2: memref<1x128xf32, #tpu.memory_space<vmem>>, %arg3: memref<1x128xf32, #tpu.memory_space<vmem>>, %arg4: memref<104x1xf32, #tpu.memory_space<vmem>>, %arg5: memref<80x1xf32, #tpu.memory_space<vmem>>, %arg6: memref<1152x128xf32, #tpu.memory_space<vmem>>, %arg7: memref<1x80x128xf32, #tpu.memory_space<vmem>>, %arg8: memref<128x128xf32, #tpu.memory_space<vmem>>, %arg9: memref<1x80x128xf32, #tpu.memory_space<vmem>>, %arg10: memref<1x80x128xf32, #tpu.memory_space<vmem>>, %arg11: memref<1x128xf32, #tpu.memory_space<vmem>>, %arg12: memref<1x128xf32, #tpu.memory_space<vmem>>, %arg13: memref<1x128xf32, #tpu.memory_space<vmem>>, %arg14: memref<1x128xf32, #tpu.memory_space<vmem>>) attributes {dimension_semantics = [#tpu.dimension_semantics<arbitrary>], iteration_bounds = array<i64: 2>, scalar_prefetch = 0 : i64, scratch_operands = 0 : i64, tpu.core_type = #tpu.core_type<tc>, window_params = [{transform_indices = @transform_0, window_bounds = array<i64: 1, 104, 128>}, {pipeline_mode = #tpu.pipeline_mode<synchronous>, transform_indices = @transform_1, window_bounds = array<i64: 1, 128>}, {pipeline_mode = #tpu.pipeline_mode<synchronous>, transform_indices = @transform_2, window_bounds = array<i64: 1, 128>}, {pipeline_mode = #tpu.pipeline_mode<synchronous>, transform_indices = @transform_3, window_bounds = array<i64: 104, 1>}, {pipeline_mode = #tpu.pipeline_mode<synchronous>, transform_indices = @transform_4, window_bounds = array<i64: 80, 1>}, {pipeline_mode = #tpu.pipeline_mode<synchronous>, transform_indices = @transform_5, window_bounds = array<i64: 1152, 128>}, {transform_indices = @transform_6, window_bounds = array<i64: 1, 80, 128>}, {pipeline_mode = #tpu.pipeline_mode<synchronous>, transform_indices = @transform_7, window_bounds = array<i64: 128, 128>}, {transform_indices = @transform_8, window_bounds = array<i64: 1, 80, 128>}, {transform_indices = @transform_9, window_bounds = array<i64: 1, 80, 128>}, {pipeline_mode = #tpu.pipeline_mode<synchronous>, transform_indices = @transform_10, window_bounds = array<i64: 1, 128>}, {pipeline_mode = #tpu.pipeline_mode<synchronous>, transform_indices = @transform_11, window_bounds = array<i64: 1, 128>}, {pipeline_mode = #tpu.pipeline_mode<synchronous>, transform_indices = @transform_12, window_bounds = array<i64: 1, 128>}, {pipeline_mode = #tpu.pipeline_mode<synchronous>, transform_indices = @transform_13, window_bounds = array<i64: 1, 128>}]} {
    %c0_i32 = arith.constant 0 : i32
    %0 = arith.cmpi eq, %arg0, %c0_i32 : i32
    %1 = arith.extui %0 : i1 to i32
    %c0_i32_0 = arith.constant 0 : i32
    %2 = arith.cmpi ne, %1, %c0_i32_0 : i32
    scf.if %2 {
      %cst_63 = arith.constant 0.000000e+00 : f32
      %88 = vector.broadcast %cst_63 : f32 to vector<1x128xf32>
      %c0_64 = arith.constant 0 : index
      %c0_65 = arith.constant 0 : index
      %89 = vector.load %arg11[%c0_64, %c0_65] : memref<1x128xf32, #tpu.memory_space<vmem>>, vector<1x128xf32>
      tpu.vector_store %arg11[%c0_64, %c0_65], %88 {strides = array<i32>} : memref<1x128xf32, #tpu.memory_space<vmem>>, vector<1x128xf32>,
      %cst_66 = arith.constant 0.000000e+00 : f32
      %90 = vector.broadcast %cst_66 : f32 to vector<1x128xf32>
      %c0_67 = arith.constant 0 : index
      %c0_68 = arith.constant 0 : index
      %91 = vector.load %arg12[%c0_67, %c0_68] : memref<1x128xf32, #tpu.memory_space<vmem>>, vector<1x128xf32>
      tpu.vector_store %arg12[%c0_67, %c0_68], %90 {strides = array<i32>} : memref<1x128xf32, #tpu.memory_space<vmem>>, vector<1x128xf32>,
      %cst_69 = arith.constant 0.000000e+00 : f32
      %92 = vector.broadcast %cst_69 : f32 to vector<1x128xf32>
      %c0_70 = arith.constant 0 : index
      %c0_71 = arith.constant 0 : index
      %93 = vector.load %arg13[%c0_70, %c0_71] : memref<1x128xf32, #tpu.memory_space<vmem>>, vector<1x128xf32>
      tpu.vector_store %arg13[%c0_70, %c0_71], %92 {strides = array<i32>} : memref<1x128xf32, #tpu.memory_space<vmem>>, vector<1x128xf32>,
      %cst_72 = arith.constant 0.000000e+00 : f32
      %94 = vector.broadcast %cst_72 : f32 to vector<1x128xf32>
      %c0_73 = arith.constant 0 : index
      %c0_74 = arith.constant 0 : index
      %95 = vector.load %arg14[%c0_73, %c0_74] : memref<1x128xf32, #tpu.memory_space<vmem>>, vector<1x128xf32>
      tpu.vector_store %arg14[%c0_73, %c0_74], %94 {strides = array<i32>} : memref<1x128xf32, #tpu.memory_space<vmem>>, vector<1x128xf32>,
    } else {
    }
    %c0 = arith.constant 0 : index
    %c0_1 = arith.constant 0 : index
    %c0_2 = arith.constant 0 : index
    %3 = vector.load %arg1[%c0, %c0_1, %c0_2] : memref<1x104x128xf32, #tpu.memory_space<vmem>>, vector<1x104x128xf32>
    %4 = vector.shape_cast %3 : vector<1x104x128xf32> to vector<104x128xf32>
    %c0_3 = arith.constant 0 : index
    %c0_4 = arith.constant 0 : index
    %5 = vector.load %arg2[%c0_3, %c0_4] : memref<1x128xf32, #tpu.memory_space<vmem>>, vector<1x128xf32>
    %6 = vector.broadcast %5 : vector<1x128xf32> to vector<104x128xf32>
    %7 = arith.mulf %4, %6 : vector<104x128xf32>
    %c0_5 = arith.constant 0 : index
    %c0_6 = arith.constant 0 : index
    %8 = vector.load %arg3[%c0_5, %c0_6] : memref<1x128xf32, #tpu.memory_space<vmem>>, vector<1x128xf32>
    %9 = vector.broadcast %8 : vector<1x128xf32> to vector<104x128xf32>
    %10 = arith.addf %7, %9 : vector<104x128xf32>
    %cst = arith.constant 0.000000e+00 : f32
    %11 = vector.broadcast %cst : f32 to vector<104x128xf32>
    %12 = arith.maximumf %10, %11 : vector<104x128xf32>
    %c0_7 = arith.constant 0 : index
    %c0_8 = arith.constant 0 : index
    %13 = vector.load %arg4[%c0_7, %c0_8] : memref<104x1xf32, #tpu.memory_space<vmem>>, vector<104x1xf32>
    %14 = vector.broadcast %13 : vector<104x1xf32> to vector<104x128xf32>
    %15 = arith.mulf %12, %14 : vector<104x128xf32>
    %cst_9 = arith.constant 0.000000e+00 : f32
    %16 = vector.broadcast %cst_9 : f32 to vector<80x128xf32>
    %17 = vector.extract_strided_slice %15 {offsets = [0, 0], sizes = [80, 128], strides = [1, 1]} : vector<104x128xf32> to vector<80x128xf32>
    %c0_10 = arith.constant 0 : index
    %c0_11 = arith.constant 0 : index
    %18 = vector.load %arg6[%c0_10, %c0_11] : memref<1152x128xf32, #tpu.memory_space<vmem>>, vector<128x128xf32>
    %cst_12 = arith.constant dense<0.000000e+00> : vector<80x128xf32>
    %19 = tpu.matmul %17, %18, %cst_12 {dimension_numbers = #tpu.dot_dimension_numbers<[1], [0], [0], [1], [0, 0, 1, 1], [], []>} : vector<80x128xf32>, vector<128x128xf32>, vector<80x128xf32> -> vector<80x128xf32>
    %20 = arith.addf %16, %19 : vector<80x128xf32>
    %21 = vector.extract_strided_slice %15 {offsets = [1, 0], sizes = [80, 128], strides = [1, 1]} : vector<104x128xf32> to vector<80x128xf32>
    %c128 = arith.constant 128 : index
    %c0_13 = arith.constant 0 : index
    %22 = vector.load %arg6[%c128, %c0_13] : memref<1152x128xf32, #tpu.memory_space<vmem>>, vector<128x128xf32>
    %cst_14 = arith.constant dense<0.000000e+00> : vector<80x128xf32>
    %23 = tpu.matmul %21, %22, %cst_14 {dimension_numbers = #tpu.dot_dimension_numbers<[1], [0], [0], [1], [0, 0, 1, 1], [], []>} : vector<80x128xf32>, vector<128x128xf32>, vector<80x128xf32> -> vector<80x128xf32>
    %24 = arith.addf %20, %23 : vector<80x128xf32>
    %25 = vector.extract_strided_slice %15 {offsets = [2, 0], sizes = [80, 128], strides = [1, 1]} : vector<104x128xf32> to vector<80x128xf32>
    %c256 = arith.constant 256 : index
    %c0_15 = arith.constant 0 : index
    %26 = vector.load %arg6[%c256, %c0_15] : memref<1152x128xf32, #tpu.memory_space<vmem>>, vector<128x128xf32>
    %cst_16 = arith.constant dense<0.000000e+00> : vector<80x128xf32>
    %27 = tpu.matmul %25, %26, %cst_16 {dimension_numbers = #tpu.dot_dimension_numbers<[1], [0], [0], [1], [0, 0, 1, 1], [], []>} : vector<80x128xf32>, vector<128x128xf32>, vector<80x128xf32> -> vector<80x128xf32>
    %28 = arith.addf %24, %27 : vector<80x128xf32>
    %29 = vector.extract_strided_slice %15 {offsets = [10, 0], sizes = [80, 128], strides = [1, 1]} : vector<104x128xf32> to vector<80x128xf32>
    %c384 = arith.constant 384 : index
    %c0_17 = arith.constant 0 : index
    %30 = vector.load %arg6[%c384, %c0_17] : memref<1152x128xf32, #tpu.memory_space<vmem>>, vector<128x128xf32>
    %cst_18 = arith.constant dense<0.000000e+00> : vector<80x128xf32>
    %31 = tpu.matmul %29, %30, %cst_18 {dimension_numbers = #tpu.dot_dimension_numbers<[1], [0], [0], [1], [0, 0, 1, 1], [], []>} : vector<80x128xf32>, vector<128x128xf32>, vector<80x128xf32> -> vector<80x128xf32>
    %32 = arith.addf %28, %31 : vector<80x128xf32>
    %33 = vector.extract_strided_slice %15 {offsets = [11, 0], sizes = [80, 128], strides = [1, 1]} : vector<104x128xf32> to vector<80x128xf32>
    %c512 = arith.constant 512 : index
    %c0_19 = arith.constant 0 : index
    %34 = vector.load %arg6[%c512, %c0_19] : memref<1152x128xf32, #tpu.memory_space<vmem>>, vector<128x128xf32>
    %cst_20 = arith.constant dense<0.000000e+00> : vector<80x128xf32>
    %35 = tpu.matmul %33, %34, %cst_20 {dimension_numbers = #tpu.dot_dimension_numbers<[1], [0], [0], [1], [0, 0, 1, 1], [], []>} : vector<80x128xf32>, vector<128x128xf32>, vector<80x128xf32> -> vector<80x128xf32>
    %36 = arith.addf %32, %35 : vector<80x128xf32>
    %37 = vector.extract_strided_slice %15 {offsets = [12, 0], sizes = [80, 128], strides = [1, 1]} : vector<104x128xf32> to vector<80x128xf32>
    %c640 = arith.constant 640 : index
    %c0_21 = arith.constant 0 : index
    %38 = vector.load %arg6[%c640, %c0_21] : memref<1152x128xf32, #tpu.memory_space<vmem>>, vector<128x128xf32>
    %cst_22 = arith.constant dense<0.000000e+00> : vector<80x128xf32>
    %39 = tpu.matmul %37, %38, %cst_22 {dimension_numbers = #tpu.dot_dimension_numbers<[1], [0], [0], [1], [0, 0, 1, 1], [], []>} : vector<80x128xf32>, vector<128x128xf32>, vector<80x128xf32> -> vector<80x128xf32>
    %40 = arith.addf %36, %39 : vector<80x128xf32>
    %41 = vector.extract_strided_slice %15 {offsets = [20, 0], sizes = [80, 128], strides = [1, 1]} : vector<104x128xf32> to vector<80x128xf32>
    %c768 = arith.constant 768 : index
    %c0_23 = arith.constant 0 : index
    %42 = vector.load %arg6[%c768, %c0_23] : memref<1152x128xf32, #tpu.memory_space<vmem>>, vector<128x128xf32>
    %cst_24 = arith.constant dense<0.000000e+00> : vector<80x128xf32>
    %43 = tpu.matmul %41, %42, %cst_24 {dimension_numbers = #tpu.dot_dimension_numbers<[1], [0], [0], [1], [0, 0, 1, 1], [], []>} : vector<80x128xf32>, vector<128x128xf32>, vector<80x128xf32> -> vector<80x128xf32>
    %44 = arith.addf %40, %43 : vector<80x128xf32>
    %45 = vector.extract_strided_slice %15 {offsets = [21, 0], sizes = [80, 128], strides = [1, 1]} : vector<104x128xf32> to vector<80x128xf32>
    %c896 = arith.constant 896 : index
    %c0_25 = arith.constant 0 : index
    %46 = vector.load %arg6[%c896, %c0_25] : memref<1152x128xf32, #tpu.memory_space<vmem>>, vector<128x128xf32>
    %cst_26 = arith.constant dense<0.000000e+00> : vector<80x128xf32>
    %47 = tpu.matmul %45, %46, %cst_26 {dimension_numbers = #tpu.dot_dimension_numbers<[1], [0], [0], [1], [0, 0, 1, 1], [], []>} : vector<80x128xf32>, vector<128x128xf32>, vector<80x128xf32> -> vector<80x128xf32>
    %48 = arith.addf %44, %47 : vector<80x128xf32>
    %49 = vector.extract_strided_slice %15 {offsets = [22, 0], sizes = [80, 128], strides = [1, 1]} : vector<104x128xf32> to vector<80x128xf32>
    %c1024 = arith.constant 1024 : index
    %c0_27 = arith.constant 0 : index
    %50 = vector.load %arg6[%c1024, %c0_27] : memref<1152x128xf32, #tpu.memory_space<vmem>>, vector<128x128xf32>
    %cst_28 = arith.constant dense<0.000000e+00> : vector<80x128xf32>
    %51 = tpu.matmul %49, %50, %cst_28 {dimension_numbers = #tpu.dot_dimension_numbers<[1], [0], [0], [1], [0, 0, 1, 1], [], []>} : vector<80x128xf32>, vector<128x128xf32>, vector<80x128xf32> -> vector<80x128xf32>
    %52 = arith.addf %48, %51 : vector<80x128xf32>
    %c0_29 = arith.constant 0 : index
    %c0_30 = arith.constant 0 : index
    %c0_31 = arith.constant 0 : index
    %53 = vector.load %arg9[%c0_29, %c0_30, %c0_31] : memref<1x80x128xf32, #tpu.memory_space<vmem>>, vector<1x80x128xf32>
    %54 = vector.shape_cast %53 : vector<1x80x128xf32> to vector<80x128xf32>
    %55 = vector.shape_cast %52 : vector<80x128xf32> to vector<1x80x128xf32>
    tpu.vector_store %arg9[%c0_29, %c0_30, %c0_31], %55 {strides = array<i32>} : memref<1x80x128xf32, #tpu.memory_space<vmem>>, vector<1x80x128xf32>,
    %c0_32 = arith.constant 0 : index
    %c0_33 = arith.constant 0 : index
    %56 = vector.load %arg5[%c0_32, %c0_33] : memref<80x1xf32, #tpu.memory_space<vmem>>, vector<80x1xf32>
    %57 = vector.broadcast %56 : vector<80x1xf32> to vector<80x128xf32>
    %58 = arith.mulf %52, %57 : vector<80x128xf32>
    %c0_34 = arith.constant 0 : index
    %c0_35 = arith.constant 0 : index
    %59 = vector.load %arg11[%c0_34, %c0_35] : memref<1x128xf32, #tpu.memory_space<vmem>>, vector<1x128xf32>
    %cst_36 = arith.constant dense<0.000000e+00> : vector<128xf32>
    %60 = vector.multi_reduction <add>, %58, %cst_36 [0] : vector<80x128xf32> to vector<128xf32>
    %61 = vector.shape_cast %60 : vector<128xf32> to vector<1x128xf32>
    %62 = arith.addf %59, %61 : vector<1x128xf32>
    %c0_37 = arith.constant 0 : index
    %c0_38 = arith.constant 0 : index
    %63 = vector.load %arg11[%c0_37, %c0_38] : memref<1x128xf32, #tpu.memory_space<vmem>>, vector<1x128xf32>
    tpu.vector_store %arg11[%c0_37, %c0_38], %62 {strides = array<i32>} : memref<1x128xf32, #tpu.memory_space<vmem>>, vector<1x128xf32>,
    %c0_39 = arith.constant 0 : index
    %c0_40 = arith.constant 0 : index
    %64 = vector.load %arg12[%c0_39, %c0_40] : memref<1x128xf32, #tpu.memory_space<vmem>>, vector<1x128xf32>
    %65 = arith.mulf %58, %58 : vector<80x128xf32>
    %cst_41 = arith.constant dense<0.000000e+00> : vector<128xf32>
    %66 = vector.multi_reduction <add>, %65, %cst_41 [0] : vector<80x128xf32> to vector<128xf32>
    %67 = vector.shape_cast %66 : vector<128xf32> to vector<1x128xf32>
    %68 = arith.addf %64, %67 : vector<1x128xf32>
    %c0_42 = arith.constant 0 : index
    %c0_43 = arith.constant 0 : index
    %69 = vector.load %arg12[%c0_42, %c0_43] : memref<1x128xf32, #tpu.memory_space<vmem>>, vector<1x128xf32>
    tpu.vector_store %arg12[%c0_42, %c0_43], %68 {strides = array<i32>} : memref<1x128xf32, #tpu.memory_space<vmem>>, vector<1x128xf32>,
    %c0_44 = arith.constant 0 : index
    %c0_45 = arith.constant 0 : index
    %c0_46 = arith.constant 0 : index
    %70 = vector.load %arg7[%c0_44, %c0_45, %c0_46] : memref<1x80x128xf32, #tpu.memory_space<vmem>>, vector<1x80x128xf32>
    %71 = vector.shape_cast %70 : vector<1x80x128xf32> to vector<80x128xf32>
    %c0_47 = arith.constant 0 : index
    %c0_48 = arith.constant 0 : index
    %72 = vector.load %arg8[%c0_47, %c0_48] : memref<128x128xf32, #tpu.memory_space<vmem>>, vector<128x128xf32>
    %cst_49 = arith.constant dense<0.000000e+00> : vector<80x128xf32>
    %73 = tpu.matmul %71, %72, %cst_49 {dimension_numbers = #tpu.dot_dimension_numbers<[1], [0], [0], [1], [0, 0, 1, 1], [], []>} : vector<80x128xf32>, vector<128x128xf32>, vector<80x128xf32> -> vector<80x128xf32>
    %c0_50 = arith.constant 0 : index
    %c0_51 = arith.constant 0 : index
    %c0_52 = arith.constant 0 : index
    %74 = vector.load %arg10[%c0_50, %c0_51, %c0_52] : memref<1x80x128xf32, #tpu.memory_space<vmem>>, vector<1x80x128xf32>
    %75 = vector.shape_cast %74 : vector<1x80x128xf32> to vector<80x128xf32>
    %76 = vector.shape_cast %73 : vector<80x128xf32> to vector<1x80x128xf32>
    tpu.vector_store %arg10[%c0_50, %c0_51, %c0_52], %76 {strides = array<i32>} : memref<1x80x128xf32, #tpu.memory_space<vmem>>, vector<1x80x128xf32>,
    %c0_53 = arith.constant 0 : index
    %c0_54 = arith.constant 0 : index
    %77 = vector.load %arg13[%c0_53, %c0_54] : memref<1x128xf32, #tpu.memory_space<vmem>>, vector<1x128xf32>
    %cst_55 = arith.constant dense<0.000000e+00> : vector<128xf32>
    %78 = vector.multi_reduction <add>, %73, %cst_55 [0] : vector<80x128xf32> to vector<128xf32>
    %79 = vector.shape_cast %78 : vector<128xf32> to vector<1x128xf32>
    %80 = arith.addf %77, %79 : vector<1x128xf32>
    %c0_56 = arith.constant 0 : index
    %c0_57 = arith.constant 0 : index
    %81 = vector.load %arg13[%c0_56, %c0_57] : memref<1x128xf32, #tpu.memory_space<vmem>>, vector<1x128xf32>
    tpu.vector_store %arg13[%c0_56, %c0_57], %80 {strides = array<i32>} : memref<1x128xf32, #tpu.memory_space<vmem>>, vector<1x128xf32>,
    %c0_58 = arith.constant 0 : index
    %c0_59 = arith.constant 0 : index
    %82 = vector.load %arg14[%c0_58, %c0_59] : memref<1x128xf32, #tpu.memory_space<vmem>>, vector<1x128xf32>
    %83 = arith.mulf %73, %73 : vector<80x128xf32>
    %cst_60 = arith.constant dense<0.000000e+00> : vector<128xf32>
    %84 = vector.multi_reduction <add>, %83, %cst_60 [0] : vector<80x128xf32> to vector<128xf32>
    %85 = vector.shape_cast %84 : vector<128xf32> to vector<1x128xf32>
    %86 = arith.addf %82, %85 : vector<1x128xf32>
    %c0_61 = arith.constant 0 : index
    %c0_62 = arith.constant 0 : index
    %87 = vector.load %arg14[%c0_61, %c0_62] : memref<1x128xf32, #tpu.memory_space<vmem>>, vector<1x128xf32>
    tpu.vector_store %arg14[%c0_61, %c0_62], %86 {strides = array<i32>} : memref<1x128xf32, #tpu.memory_space<vmem>>, vector<1x128xf32>,
    return
  }
  func.func @transform_0(%arg0: i32) -> (i32, i32, i32) {
    %c0_i32 = arith.constant 0 : i32
    %c0_i32_0 = arith.constant 0 : i32
    %c0_i32_1 = arith.constant 0 : i32
    return %arg0, %c0_i32, %c0_i32_0 : i32, i32, i32
  }
  func.func @transform_1(%arg0: i32) -> (i32, i32) {
    %c0_i32 = arith.constant 0 : i32
    %c0_i32_0 = arith.constant 0 : i32
    %c0_i32_1 = arith.constant 0 : i32
    return %c0_i32, %c0_i32_0 : i32, i32
  }
  func.func @transform_2(%arg0: i32) -> (i32, i32) {
    %c0_i32 = arith.constant 0 : i32
    %c0_i32_0 = arith.constant 0 : i32
    %c0_i32_1 = arith.constant 0 : i32
    return %c0_i32, %c0_i32_0 : i32, i32
  }
  func.func @transform_3(%arg0: i32) -> (i32, i32) {
    %c0_i32 = arith.constant 0 : i32
    %c0_i32_0 = arith.constant 0 : i32
    %c0_i32_1 = arith.constant 0 : i32
    return %c0_i32, %c0_i32_0 : i32, i32
  }
  func.func @transform_4(%arg0: i32) -> (i32, i32) {
    %c0_i32 = arith.constant 0 : i32
    %c0_i32_0 = arith.constant 0 : i32
    %c0_i32_1 = arith.constant 0 : i32
    return %c0_i32, %c0_i32_0 : i32, i32
  }
  func.func @transform_5(%arg0: i32) -> (i32, i32) {
    %c0_i32 = arith.constant 0 : i32
    %c0_i32_0 = arith.constant 0 : i32
    %c0_i32_1 = arith.constant 0 : i32
    return %c0_i32, %c0_i32_0 : i32, i32
  }
  func.func @transform_6(%arg0: i32) -> (i32, i32, i32) {
    %c0_i32 = arith.constant 0 : i32
    %c0_i32_0 = arith.constant 0 : i32
    %c0_i32_1 = arith.constant 0 : i32
    return %arg0, %c0_i32, %c0_i32_0 : i32, i32, i32
  }
  func.func @transform_7(%arg0: i32) -> (i32, i32) {
    %c0_i32 = arith.constant 0 : i32
    %c0_i32_0 = arith.constant 0 : i32
    %c0_i32_1 = arith.constant 0 : i32
    return %c0_i32, %c0_i32_0 : i32, i32
  }
  func.func @transform_8(%arg0: i32) -> (i32, i32, i32) {
    %c0_i32 = arith.constant 0 : i32
    %c0_i32_0 = arith.constant 0 : i32
    %c0_i32_1 = arith.constant 0 : i32
    return %arg0, %c0_i32, %c0_i32_0 : i32, i32, i32
  }
  func.func @transform_9(%arg0: i32) -> (i32, i32, i32) {
    %c0_i32 = arith.constant 0 : i32
    %c0_i32_0 = arith.constant 0 : i32
    %c0_i32_1 = arith.constant 0 : i32
    return %arg0, %c0_i32, %c0_i32_0 : i32, i32, i32
  }
  func.func @transform_10(%arg0: i32) -> (i32, i32) {
    %c0_i32 = arith.constant 0 : i32
    %c0_i32_0 = arith.constant 0 : i32
    %c0_i32_1 = arith.constant 0 : i32
    return %c0_i32, %c0_i32_0 : i32, i32
  }
  func.func @transform_11(%arg0: i32) -> (i32, i32) {
    %c0_i32 = arith.constant 0 : i32
    %c0_i32_0 = arith.constant 0 : i32
    %c0_i32_1 = arith.constant 0 : i32
    return %c0_i32, %c0_i32_0 : i32, i32
  }
  func.func @transform_12(%arg0: i32) -> (i32, i32) {
    %c0_i32 = arith.constant 0 : i32
    %c0_i32_0 = arith.constant 0 : i32
    %c0_i32_1 = arith.constant 0 : i32
    return %c0_i32, %c0_i32_0 : i32, i32
  }
  func.func @transform_13(%arg0: i32) -> (i32, i32) {
    %c0_i32 = arith.constant 0 : i32
    %c0_i32_0 = arith.constant 0 : i32
    %c0_i32_1 = arith.constant 0 : i32
    return %c0_i32, %c0_i32_0 : i32, i32
  }
}

module attributes {stable_mosaic.version = 11 : i64} {
  func.func @kernel(%arg0: i32, %arg1: memref<1x80x128xf32, #tpu.memory_space<vmem>>, %arg2: memref<1x128xf32, #tpu.memory_space<vmem>>, %arg3: memref<1x128xf32, #tpu.memory_space<vmem>>, %arg4: memref<1x80x128xf32, #tpu.memory_space<vmem>>, %arg5: memref<1x128xf32, #tpu.memory_space<vmem>>, %arg6: memref<1x128xf32, #tpu.memory_space<vmem>>, %arg7: memref<1x80x128xf32, #tpu.memory_space<vmem>>) attributes {dimension_semantics = [#tpu.dimension_semantics<parallel>], iteration_bounds = array<i64: 2>, scalar_prefetch = 0 : i64, scratch_operands = 0 : i64, tpu.core_type = #tpu.core_type<tc>, window_params = [{transform_indices = @transform_0, window_bounds = array<i64: 1, 80, 128>}, {pipeline_mode = #tpu.pipeline_mode<synchronous>, transform_indices = @transform_1, window_bounds = array<i64: 1, 128>}, {pipeline_mode = #tpu.pipeline_mode<synchronous>, transform_indices = @transform_2, window_bounds = array<i64: 1, 128>}, {transform_indices = @transform_3, window_bounds = array<i64: 1, 80, 128>}, {pipeline_mode = #tpu.pipeline_mode<synchronous>, transform_indices = @transform_4, window_bounds = array<i64: 1, 128>}, {pipeline_mode = #tpu.pipeline_mode<synchronous>, transform_indices = @transform_5, window_bounds = array<i64: 1, 128>}, {transform_indices = @transform_6, window_bounds = array<i64: 1, 80, 128>}]} {
    %c0 = arith.constant 0 : index
    %c0_0 = arith.constant 0 : index
    %c0_1 = arith.constant 0 : index
    %0 = vector.load %arg4[%c0, %c0_0, %c0_1] : memref<1x80x128xf32, #tpu.memory_space<vmem>>, vector<1x80x128xf32>
    %1 = vector.shape_cast %0 : vector<1x80x128xf32> to vector<80x128xf32>
    %c0_2 = arith.constant 0 : index
    %c0_3 = arith.constant 0 : index
    %2 = vector.load %arg5[%c0_2, %c0_3] : memref<1x128xf32, #tpu.memory_space<vmem>>, vector<1x128xf32>
    %3 = vector.broadcast %2 : vector<1x128xf32> to vector<80x128xf32>
    %4 = arith.mulf %1, %3 : vector<80x128xf32>
    %c0_4 = arith.constant 0 : index
    %c0_5 = arith.constant 0 : index
    %5 = vector.load %arg6[%c0_4, %c0_5] : memref<1x128xf32, #tpu.memory_space<vmem>>, vector<1x128xf32>
    %6 = vector.broadcast %5 : vector<1x128xf32> to vector<80x128xf32>
    %7 = arith.addf %4, %6 : vector<80x128xf32>
    %c0_6 = arith.constant 0 : index
    %c0_7 = arith.constant 0 : index
    %c0_8 = arith.constant 0 : index
    %8 = vector.load %arg1[%c0_6, %c0_7, %c0_8] : memref<1x80x128xf32, #tpu.memory_space<vmem>>, vector<1x80x128xf32>
    %9 = vector.shape_cast %8 : vector<1x80x128xf32> to vector<80x128xf32>
    %c0_9 = arith.constant 0 : index
    %c0_10 = arith.constant 0 : index
    %10 = vector.load %arg2[%c0_9, %c0_10] : memref<1x128xf32, #tpu.memory_space<vmem>>, vector<1x128xf32>
    %11 = vector.broadcast %10 : vector<1x128xf32> to vector<80x128xf32>
    %12 = arith.mulf %9, %11 : vector<80x128xf32>
    %c0_11 = arith.constant 0 : index
    %c0_12 = arith.constant 0 : index
    %13 = vector.load %arg3[%c0_11, %c0_12] : memref<1x128xf32, #tpu.memory_space<vmem>>, vector<1x128xf32>
    %14 = vector.broadcast %13 : vector<1x128xf32> to vector<80x128xf32>
    %15 = arith.addf %12, %14 : vector<80x128xf32>
    %16 = arith.addf %15, %7 : vector<80x128xf32>
    %cst = arith.constant 0.000000e+00 : f32
    %17 = vector.broadcast %cst : f32 to vector<80x128xf32>
    %18 = arith.maximumf %16, %17 : vector<80x128xf32>
    %c0_13 = arith.constant 0 : index
    %c0_14 = arith.constant 0 : index
    %c0_15 = arith.constant 0 : index
    %19 = vector.load %arg7[%c0_13, %c0_14, %c0_15] : memref<1x80x128xf32, #tpu.memory_space<vmem>>, vector<1x80x128xf32>
    %20 = vector.shape_cast %19 : vector<1x80x128xf32> to vector<80x128xf32>
    %21 = vector.shape_cast %18 : vector<80x128xf32> to vector<1x80x128xf32>
    tpu.vector_store %arg7[%c0_13, %c0_14, %c0_15], %21 {strides = array<i32>} : memref<1x80x128xf32, #tpu.memory_space<vmem>>, vector<1x80x128xf32>,
    return
  }
  func.func @transform_0(%arg0: i32) -> (i32, i32, i32) {
    %c0_i32 = arith.constant 0 : i32
    %c0_i32_0 = arith.constant 0 : i32
    %c0_i32_1 = arith.constant 0 : i32
    return %arg0, %c0_i32, %c0_i32_0 : i32, i32, i32
  }
  func.func @transform_1(%arg0: i32) -> (i32, i32) {
    %c0_i32 = arith.constant 0 : i32
    %c0_i32_0 = arith.constant 0 : i32
    %c0_i32_1 = arith.constant 0 : i32
    return %c0_i32, %c0_i32_0 : i32, i32
  }
  func.func @transform_2(%arg0: i32) -> (i32, i32) {
    %c0_i32 = arith.constant 0 : i32
    %c0_i32_0 = arith.constant 0 : i32
    %c0_i32_1 = arith.constant 0 : i32
    return %c0_i32, %c0_i32_0 : i32, i32
  }
  func.func @transform_3(%arg0: i32) -> (i32, i32, i32) {
    %c0_i32 = arith.constant 0 : i32
    %c0_i32_0 = arith.constant 0 : i32
    %c0_i32_1 = arith.constant 0 : i32
    return %arg0, %c0_i32, %c0_i32_0 : i32, i32, i32
  }
  func.func @transform_4(%arg0: i32) -> (i32, i32) {
    %c0_i32 = arith.constant 0 : i32
    %c0_i32_0 = arith.constant 0 : i32
    %c0_i32_1 = arith.constant 0 : i32
    return %c0_i32, %c0_i32_0 : i32, i32
  }
  func.func @transform_5(%arg0: i32) -> (i32, i32) {
    %c0_i32 = arith.constant 0 : i32
    %c0_i32_0 = arith.constant 0 : i32
    %c0_i32_1 = arith.constant 0 : i32
    return %c0_i32, %c0_i32_0 : i32, i32
  }
  func.func @transform_6(%arg0: i32) -> (i32, i32, i32) {
    %c0_i32 = arith.constant 0 : i32
    %c0_i32_0 = arith.constant 0 : i32
    %c0_i32_1 = arith.constant 0 : i32
    return %arg0, %c0_i32, %c0_i32_0 : i32, i32, i32
  }
}

</mosaic_0001>

<bundles_post_ra>
// kernel: resblock_forward.3
= control target key start
LH: loop header
LB: loop body
LE: loop exit
PB: predicated region body
PF: predicated region fallthrough
CT: control target
= control target key end

     0   :  { %s693_s15 = smov 0   ;;  %s832_s0 = inlined_call_operand.vmem [shape: f32[2,104,128], index: 0, kind: input, shape index: {}]   ;;  %s833_s1 = inlined_call_operand.vmem [shape: f32[128,128], index: 1, kind: input, shape index: {}]   ;;  %s834_s2 = inlined_call_operand.vmem [shape: f32[2,104,128], index: 2, kind: output, shape index: {0}]   ;;  %s835_s3 = inlined_call_operand.vmem [shape: f32[1,128], index: 3, kind: output, shape index: {1}]   ;;  %s836_s4 = inlined_call_operand.vmem [shape: f32[1,128], index: 4, kind: output, shape index: {2}]  }
   0x1 LB: > { %s493_s16 = sadd.s32 4294967295, %s662_s15   ;;  %p497_p0 = scmp.ge.s32.totalorder %s662_s15, 1  ;;  %s662_s15 = sphi %s693_s15, %s15_s15  }
   0x2   : > { %p157_p1 = scmp.lt.s32.totalorder %s662_s15, 3 }
   0x4   : > { %p158_p2 = pnand %p497_p0, %p157_p1 }
   0x5   : > { %p183_p3 = scmp.lt.s32.totalorder (!%p158_p2), %s493_s16, 1  ;;  %p500_p4 = scmp.ne.s32.totalorder (!%p158_p2), %s493_s16, 0 }
   0x6   : > { %161 = sbr.rel (%p158_p2) target bundleno = 322 (0x142), region = 28 }
   0xd   : > { %s184_s17 = scalar_select %p183_p3, %s493_s16, 1 }
   0xe   : > { %196 = sbr.rel (%p500_p4) target bundleno = 21 (0x15), region = 32  ;;  %v664_v0 = vmov (!%p500_p4), 0.0  }
   0xf   : > { %s643_s18 = smul.u32 104, %s184_s17  ;;  %197 = vst [vmem:[%s835_s3] sm:$0x1] (!%p500_p4), %v664_v0  ;;  %198 = vst [vmem:[%s836_s4] sm:$0x1] (!%p500_p4), %v664_v0 }
  0x11   : > { %s704_s21 = scalar_lea.vmem %s832_s0, %s643_s18  ;;  %s709_s24 = scalar_lea.vmem %s834_s2, %s643_s18 }
  0x15 PF: > { %v212_v1 = vld [vmem:[%s833_s1] sm:$0xff]  ;;  %v213_v2 = vld [vmem:[%s833_s1 + $0x8] sm:$0xff]  ;;  %v214_v3 = vld [vmem:[%s833_s1 + $0x10] sm:$0xff]  ;;  %v665_v4 = vmov 0.0|0.0   ;;  %vm666_vm0 = vmmov 0   ;;  %v667_v7 = vmov 0.0  }
  0x16   : > { %603 = vmatprep.subr.bf16.mxu0 %v665_v4  ;;  %v604_v5 = vpack.c.bf16 %v213_v2, %v212_v1  ;;  %v215_v6 = vld [vmem:[%s833_s1 + $0x18] sm:$0xff]  ;;  %627 = vmatprep.subr.bf16.mxu1 %v665_v4  ;;  %v216_v9 = vld [vmem:[%s833_s1 + $0x20] sm:$0xff]  ;;  %v217_v10 = vld [vmem:[%s833_s1 + $0x28] sm:$0xff] }
  0x17   : > { %564 = vmatprep.mubr.msk.f32.mxu0 %vm666_vm0, %v667_v7  ;;  %585 = vmatprep.mubr.msk.f32.mxu1 %vm666_vm0, %v667_v7  ;;  %v607_v8 = vpack.c.bf16 %v215_v6, %v214_v3  ;;  %v610_v11 = vpack.c.bf16 %v217_v10, %v216_v9  ;;  %v218_v12 = vld [vmem:[%s833_s1 + $0x30] sm:$0xff]  ;;  %v219_v13 = vld [vmem:[%s833_s1 + $0x38] sm:$0xff]  ;;  %v220_v15 = vld [vmem:[%s833_s1 + $0x40] sm:$0xff] }
  0x18   : > { %605 = vmatpush3.bf16.msra.mxu0 %v604_v5  ;;  %635 = vmatpush3.bf16.msra.mxu1 %v604_v5  ;;  %v613_v14 = vpack.c.bf16 %v219_v13, %v218_v12  ;;  %v221_v16 = vld [vmem:[%s833_s1 + $0x48] sm:$0xff]  ;;  %v222_v18 = vld [vmem:[%s833_s1 + $0x50] sm:$0xff]  ;;  %v223_v19 = vld [vmem:[%s833_s1 + $0x58] sm:$0xff] }
  0x19   : > { %606 = vmatprep.subr.bf16.mxu0 %v665_v4  ;;  %628 = vmatprep.subr.bf16.mxu1 %v665_v4  ;;  %v616_v17 = vpack.c.bf16 %v221_v16, %v220_v15  ;;  %v619_v20 = vpack.c.bf16 %v223_v19, %v222_v18  ;;  %v224_v21 = vld [vmem:[%s833_s1 + $0x60] sm:$0xff]  ;;  %v225_v22 = vld [vmem:[%s833_s1 + $0x68] sm:$0xff]  ;;  %v226_v24 = vld [vmem:[%s833_s1 + $0x70] sm:$0xff] }
  0x1a   : > { %v622_v23 = vpack.c.bf16 %v225_v22, %v224_v21  ;;  %v227_v25 = vld [vmem:[%s833_s1 + $0x78] sm:$0xff]  ;;  %v199_v27 = vld [vmem:[%s704_s21] sm:$0xff]  ;;  %v200_v29 = vld [vmem:[%s704_s21 + $0x8] sm:$0xff] }
  0x1b   : > { %v625_v26 = vpack.c.bf16 %v227_v25, %v226_v24  ;;  %v206_v28 = vld [vmem:[%s704_s21 + $0x38] sm:$0xff]  ;;  %v207_v30 = vld [vmem:[%s704_s21 + $0x40] sm:$0xff]  ;;  %v201_v31 = vld [vmem:[%s704_s21 + $0x10] sm:$0xff] }
  0x1c   : > { %608 = vmatpush3.bf16.msra.mxu0 %v607_v8  ;;  %636 = vmatpush3.bf16.msra.mxu1 %v607_v8  ;;  %v208_v32 = vld [vmem:[%s704_s21 + $0x48] sm:$0xff]  ;;  %v202_v33 = vld [vmem:[%s704_s21 + $0x18] sm:$0xff]  ;;  %v209_v34 = vld [vmem:[%s704_s21 + $0x50] sm:$0xff] }
  0x1d   : > { %609 = vmatprep.subr.bf16.mxu0 %v665_v4  ;;  %629 = vmatprep.subr.bf16.mxu1 %v665_v4  ;;  %v203_v35 = vld [vmem:[%s704_s21 + $0x20] sm:$0xff]  ;;  %v210_v36 = vld [vmem:[%s704_s21 + $0x58] sm:$0xff]  ;;  %v204_v37 = vld [vmem:[%s704_s21 + $0x28] sm:$0xff] }
  0x1e   : > { %v211_v38 = vld [vmem:[%s704_s21 + $0x60] sm:$0xff]  ;;  %v205_v39 = vld [vmem:[%s704_s21 + $0x30] sm:$0xff] }
  0x20   : > { %611 = vmatpush3.bf16.msra.mxu0 %v610_v11  ;;  %637 = vmatpush3.bf16.msra.mxu1 %v610_v11 }
  0x21   : > { %612 = vmatprep.subr.bf16.mxu0 %v665_v4  ;;  %630 = vmatprep.subr.bf16.mxu1 %v665_v4 }
  0x24   : > { %614 = vmatpush3.bf16.msra.mxu0 %v613_v14  ;;  %638 = vmatpush3.bf16.msra.mxu1 %v613_v14 }
  0x25   : > { %615 = vmatprep.subr.bf16.mxu0 %v665_v4  ;;  %631 = vmatprep.subr.bf16.mxu1 %v665_v4 }
  0x28   : > { %617 = vmatpush3.bf16.msra.mxu0 %v616_v17  ;;  %639 = vmatpush3.bf16.msra.mxu1 %v616_v17 }
  0x29   : > { %618 = vmatprep.subr.bf16.mxu0 %v665_v4  ;;  %632 = vmatprep.subr.bf16.mxu1 %v665_v4 }
  0x2c   : > { %620 = vmatpush3.bf16.msra.mxu0 %v619_v20  ;;  %640 = vmatpush3.bf16.msra.mxu1 %v619_v20 }
  0x2d   : > { %621 = vmatprep.subr.bf16.mxu0 %v665_v4  ;;  %633 = vmatprep.subr.bf16.mxu1 %v665_v4 }
  0x30   : > { %623 = vmatpush3.bf16.msra.mxu0 %v622_v23  ;;  %641 = vmatpush3.bf16.msra.mxu1 %v622_v23 }
  0x31   : > { %624 = vmatprep.subr.bf16.mxu0 %v665_v4  ;;  %634 = vmatprep.subr.bf16.mxu1 %v665_v4 }
  0x34   : > { %626 = vmatpush3.bf16.msra.mxu0 %v625_v26  ;;  %642 = vmatpush3.bf16.msra.mxu1 %v625_v26 }
  0x37   : > { %565 = vmatmul.mubr.f32.vlgmr.msra.gmra.mrb[0].mxu0 %v199_v27  ;;  %586 = vmatmul.mubr.f32.vlgmr.msra.gmra.mrb[0].mxu1 %v206_v28 }
  0x38   : > { %567 = vmatprep.mubr.msk.f32.mxu0 %vm666_vm0, %v667_v7  ;;  %588 = vmatprep.mubr.msk.f32.mxu1 %vm666_vm0, %v667_v7 }
  0x3b   : > { %568 = vmatmul.mubr.f32.gmra.mrb[2].mxu0 %v200_v29  ;;  %589 = vmatmul.mubr.f32.gmra.mrb[2].mxu1 %v207_v30 }
  0x3c   : > { %570 = vmatprep.mubr.msk.f32.mxu0 %vm666_vm0, %v667_v7  ;;  %591 = vmatprep.mubr.msk.f32.mxu1 %vm666_vm0, %v667_v7 }
  0x3f   : > { %571 = vmatmul.mubr.f32.gmra.mrb[4].mxu0 %v201_v31  ;;  %592 = vmatmul.mubr.f32.gmra.mrb[4].mxu1 %v208_v32 }
  0x40   : > { %573 = vmatprep.mubr.msk.f32.mxu0 %vm666_vm0, %v667_v7  ;;  %594 = vmatprep.mubr.msk.f32.mxu1 %vm666_vm0, %v667_v7 }
  0x43   : > { %574 = vmatmul.mubr.f32.gmra.mrb[6].mxu0 %v202_v33  ;;  %595 = vmatmul.mubr.f32.gmra.mrb[6].mxu1 %v209_v34 }
  0x44   : > { %576 = vmatprep.mubr.msk.f32.mxu0 %vm666_vm0, %v667_v7  ;;  %597 = vmatprep.mubr.msk.f32.mxu1 %vm666_vm0, %v667_v7 }
  0x47   : > { %577 = vmatmul.mubr.f32.gmra.mrb[8].mxu0 %v203_v35  ;;  %598 = vmatmul.mubr.f32.gmra.mrb[8].mxu1 %v210_v36 }
  0x48   : > { %579 = vmatprep.mubr.msk.f32.mxu0 %vm666_vm0, %v667_v7  ;;  %600 = vmatprep.mubr.msk.f32.mxu1 %vm666_vm0, %v667_v7 }
  0x4b   : > { %580 = vmatmul.mubr.f32.gmra.mrb[10].mxu0 %v204_v37  ;;  %601 = vmatmul.mubr.f32.gmra.mrb[10].mxu1 %v211_v38 }
  0x4c   : > { %582 = vmatprep.mubr.msk.f32.mxu0 %vm666_vm0, %v667_v7 }
  0x4f   : > { %583 = vmatmul.mubr.f32.gmra.mrb[12].mxu0 %v205_v39 }
 0x10a   : > { %v294_v40 = vpop.f32.mrb[0].mxu0  ;;  %v329_v41 = vpop.f32.mrb[0].mxu1 }
 0x10b   : > { %358 = vst [vmem:[%s709_s24] sm:$0xff] %v294_v40  ;;  %v566_v42 = vpop.f32.mrb[1].mxu0  ;;  %365 = vst [vmem:[%s709_s24 + $0x38] sm:$0xff] %v329_v41  ;;  %v587_v43 = vpop.f32.mrb[1].mxu1  ;;  %v393_v46 = vmul.f32 %v294_v40, %v294_v40  ;;  %v400_v20 = vmul.f32 %v329_v41, %v329_v41 }
 0x10e   : > { %v299_v44 = vpop.f32.mrb[2].mxu0  ;;  %v334_v45 = vpop.f32.mrb[2].mxu1 }
 0x10f   : > { %359 = vst [vmem:[%s709_s24 + $0x8] sm:$0xff] %v299_v44  ;;  %v372_v47 = vadd.f32 %v299_v44, %v294_v40  ;;  %v394_v48 = vmul.f32 %v299_v44, %v299_v44  ;;  %v569_v49 = vpop.f32.mrb[3].mxu0  ;;  %366 = vst [vmem:[%s709_s24 + $0x40] sm:$0xff] %v334_v45  ;;  %v590_v50 = vpop.f32.mrb[3].mxu1  ;;  %v401_v23 = vmul.f32 %v334_v45, %v334_v45 }
 0x111   : > { %v406_v51 = vadd.f32 %v394_v48, %v393_v46  ;;  %v371_v48 = vld [vmem:[%s835_s3] sm:$0x1] }
 0x112   : > { %v304_v52 = vpop.f32.mrb[4].mxu0  ;;  %v339_v53 = vpop.f32.mrb[4].mxu1 }
 0x113   : > { %360 = vst [vmem:[%s709_s24 + $0x10] sm:$0xff] %v304_v52  ;;  %v373_v54 = vadd.f32 %v372_v47, %v304_v52  ;;  %v395_v55 = vmul.f32 %v304_v52, %v304_v52  ;;  %v572_v56 = vpop.f32.mrb[5].mxu0  ;;  %367 = vst [vmem:[%s709_s24 + $0x48] sm:$0xff] %v339_v53  ;;  %v593_v57 = vpop.f32.mrb[5].mxu1  ;;  %v402_v26 = vmul.f32 %v339_v53, %v339_v53 }
 0x115   : > { %v407_v58 = vadd.f32 %v406_v51, %v395_v55  ;;  %v392_v51 = vld [vmem:[%s836_s4] sm:$0x1] }
 0x116   : > { %v309_v59 = vpop.f32.mrb[6].mxu0  ;;  %v344_v60 = vpop.f32.mrb[6].mxu1 }
 0x117   : > { %361 = vst [vmem:[%s709_s24 + $0x18] sm:$0xff] %v309_v59  ;;  %v374_v61 = vadd.f32 %v373_v54, %v309_v59  ;;  %v396_v62 = vmul.f32 %v309_v59, %v309_v59  ;;  %v575_v63 = vpop.f32.mrb[7].mxu0  ;;  %368 = vst [vmem:[%s709_s24 + $0x50] sm:$0xff] %v344_v60  ;;  %v596_v0 = vpop.f32.mrb[7].mxu1  ;;  %v403_v30 = vmul.f32 %v344_v60, %v344_v60 }
 0x119   : > { %v408_v1 = vadd.f32 %v407_v58, %v396_v62 }
 0x11a   : > { %v314_v2 = vpop.f32.mrb[8].mxu0  ;;  %v349_v3 = vpop.f32.mrb[8].mxu1 }
 0x11b   : > { %362 = vst [vmem:[%s709_s24 + $0x20] sm:$0xff] %v314_v2  ;;  %v375_v4 = vadd.f32 %v374_v61, %v314_v2  ;;  %v397_v5 = vmul.f32 %v314_v2, %v314_v2  ;;  %v578_v6 = vpop.f32.mrb[9].mxu0  ;;  %369 = vst [vmem:[%s709_s24 + $0x58] sm:$0xff] %v349_v3  ;;  %v599_v7 = vpop.f32.mrb[9].mxu1  ;;  %v404_v34 = vmul.f32 %v349_v3, %v349_v3 }
 0x11d   : > { %v409_v8 = vadd.f32 %v408_v1, %v397_v5 }
 0x11e   : > { %v319_v9 = vpop.f32.mrb[10].mxu0  ;;  %v354_v10 = vpop.f32.mrb[10].mxu1 }
 0x11f   : > { %363 = vst [vmem:[%s709_s24 + $0x28] sm:$0xff] %v319_v9  ;;  %v376_v11 = vadd.f32 %v375_v4, %v319_v9  ;;  %v398_v12 = vmul.f32 %v319_v9, %v319_v9  ;;  %v581_v13 = vpop.f32.mrb[11].mxu0  ;;  %370 = vst [vmem:[%s709_s24 + $0x60] sm:$0xff] %v354_v10  ;;  %v602_v14 = vpop.f32.mrb[11].mxu1  ;;  %v405_v35 = vmul.f32 %v354_v10, %v354_v10 }
 0x121   : > { %v410_v15 = vadd.f32 %v409_v8, %v398_v12 }
 0x122   : > { %v324_v16 = vpop.f32.mrb[12].mxu0 }
 0x123   : > { %364 = vst [vmem:[%s709_s24 + $0x30] sm:$0xff] %v324_v16  ;;  %v377_v17 = vadd.f32 %v376_v11, %v324_v16  ;;  %v399_v18 = vmul.f32 %v324_v16, %v324_v16  ;;  %v584_v19 = vpop.f32.mrb[13].mxu0 }
 0x125   : > { %v378_v21 = vadd.f32 %v377_v17, %v329_v41  ;;  %v411_v22 = vadd.f32 %v410_v15, %v399_v18 }
 0x127   : > { %v412_v24 = vadd.f32 %v411_v22, %v400_v20  ;;  %v379_v25 = vadd.f32 %v378_v21, %v334_v45 }
 0x129   : > { %v380_v27 = vadd.f32 %v379_v25, %v339_v53  ;;  %v413_v28 = vadd.f32 %v412_v24, %v401_v23 }
 0x12b   : > { %v381_v29 = vadd.f32 %v380_v27, %v344_v60  ;;  %v414_v31 = vadd.f32 %v413_v28, %v402_v26 }
 0x12d   : > { %v415_v32 = vadd.f32 %v414_v31, %v403_v30  ;;  %v382_v33 = vadd.f32 %v381_v29, %v349_v3 }
 0x12f   : > { %v416_v36 = vadd.f32 %v415_v32, %v404_v34  ;;  %v383_v37 = vadd.f32 %v382_v33, %v354_v10 }
 0x131   : > { %v384_v38 = vrot.slane %v383_v37, 4  ;;  %v417_v39 = vadd.f32 %v416_v36, %v405_v35 }
 0x133   : > { %v385_v40 = vadd.f32 %v384_v38, %v383_v37  ;;  %v418_v41 = vrot.slane %v417_v39, 4 }
 0x135   : > { %v386_v42 = vrot.slane %v385_v40, 2  ;;  %v419_v43 = vadd.f32 %v418_v41, %v417_v39 }
 0x137   : > { %v387_v44 = vadd.f32 %v386_v42, %v385_v40  ;;  %v420_v45 = vrot.slane %v419_v43, 2 }
 0x139   : > { %v388_v46 = vrot.slane %v387_v44, 1  ;;  %v421_v47 = vadd.f32 %v420_v45, %v419_v43 }
 0x13b   : > { %v389_v49 = vadd.f32 %v388_v46, %v387_v44  ;;  %v422_v50 = vrot.slane %v421_v47, 1 }
 0x13d   : > { %v390_v52 = vadd.f32 %v389_v49, %v371_v48  ;;  %v423_v53 = vadd.f32 %v422_v50, %v421_v47 }
 0x13f   : > { %391 = vst [vmem:[%s835_s3] sm:$0x1] %v390_v52  ;;  %v424_v54 = vadd.f32 %v423_v53, %v392_v51 }
 0x141   : > { %425 = vst [vmem:[%s836_s4] sm:$0x1] %v424_v54 }
 0x142 PF: > { %s15_s15 = sadd.s32 1, %s662_s15  }
 0x143   : > { %p12_p5 = scmp.ge.s32.totalorder %s15_s15, 4  }
 0x145   :  { %14 = sbr.rel (!%p12_p5) target bundleno = 1 (0x1), region = 78 }

// kernel: resblock_forward.5
= control target key start
LH: loop header
LB: loop body
LE: loop exit
PB: predicated region body
PF: predicated region fallthrough
CT: control target
= control target key end

     0   :  { %s523_s21 = smov 0   ;;  %s644_s0 = inlined_call_operand.vmem [shape: f32[2,80,128], index: 0, kind: input, shape index: {}]   ;;  %s645_s1 = inlined_call_operand.vmem [shape: f32[1,128], index: 1, kind: input, shape index: {}]   ;;  %s646_s2 = inlined_call_operand.vmem [shape: f32[1,128], index: 2, kind: input, shape index: {}]   ;;  %s647_s3 = inlined_call_operand.vmem [shape: f32[2,80,128], index: 3, kind: input, shape index: {}]   ;;  %s648_s4 = inlined_call_operand.vmem [shape: f32[1,128], index: 4, kind: input, shape index: {}]   ;;  %s649_s5 = inlined_call_operand.vmem [shape: f32[1,128], index: 5, kind: input, shape index: {}]   ;;  %s650_s6 = inlined_call_operand.vmem [shape: f32[2,80,128], index: 6, kind: output, shape index: {}]  }
   0x1 LB: > { %s457_s22 = sadd.s32 4294967295, %s486_s21   ;;  %p461_p0 = scmp.ge.s32.totalorder %s486_s21, 1  ;;  %s486_s21 = sphi %s523_s21, %s16_s21  }
   0x2   : > { %p222_p1 = scmp.lt.s32.totalorder %s486_s21, 3 }
   0x4   : > { %p223_p2 = pnand %p461_p0, %p222_p1 }
   0x5   : > { %p257_p3 = scmp.lt.s32.totalorder (!%p223_p2), %s457_s22, 1  ;;  %v536_v0 = vld [vmem:[%s648_s4] ss:$0 sm:$0xff] (!%p223_p2) }
   0x6   : > { %226 = sbr.rel (%p223_p2) target bundleno = 39 (0x27), region = 44  ;;  %v541_v1 = vld [vmem:[%s645_s1] ss:$0 sm:$0xff] (!%p223_p2) }
   0x7   : > { %v558_v2 = vld [vmem:[%s649_s5] ss:$0 sm:$0xff] (!%p223_p2) }
   0x8   : > { %v563_v3 = vld [vmem:[%s646_s2] ss:$0 sm:$0xff] (!%p223_p2) }
   0xd   : > { %s652_s22 = smov (!%p257_p3, %s457_s22), 1 }
   0xe   : > { %s531_s23 = smul.u32 80, %s652_s22 }
  0x10   : > { %s547_s30 = scalar_lea.vmem %s644_s0, %s531_s23  ;;  %s553_s9 = scalar_lea.vmem %s647_s3, %s531_s23 }
  0x11   : > { %v272_v4 = vld [vmem:[%s553_s9] sm:$0xff]  ;;  %v273_v6 = vld [vmem:[%s553_s9 + $0x8] sm:$0xff]  ;;  %v274_v11 = vld [vmem:[%s553_s9 + $0x10] sm:$0xff]  ;;  %s598_s16 = scalar_lea.vmem %s650_s6, %s531_s23 }
  0x12   : > { %v316_v5 = vld [vmem:[%s547_s30] sm:$0xff]  ;;  %v289_v7 = vmul.f32 %v536_v0, %v272_v4  ;;  %v290_v9 = vmul.f32 %v536_v0, %v273_v6  ;;  %v317_v10 = vld [vmem:[%s547_s30 + $0x8] sm:$0xff]  ;;  %v318_v12 = vld [vmem:[%s547_s30 + $0x10] sm:$0xff]  ;;  %v291_v14 = vmul.f32 %v536_v0, %v274_v11 }
  0x13   : > { %v333_v8 = vmul.f32 %v541_v1, %v316_v5  ;;  %v334_v13 = vmul.f32 %v541_v1, %v317_v10  ;;  %v335_v15 = vmul.f32 %v541_v1, %v318_v12  ;;  %v275_v16 = vld [vmem:[%s553_s9 + $0x18] sm:$0xff]  ;;  %v276_v18 = vld [vmem:[%s553_s9 + $0x20] sm:$0xff]  ;;  %v277_v24 = vld [vmem:[%s553_s9 + $0x28] sm:$0xff] }
  0x14   : > { %v319_v17 = vld [vmem:[%s547_s30 + $0x18] sm:$0xff]  ;;  %v306_v19 = vadd.f32 %v558_v2, %v289_v7  ;;  %v307_v21 = vadd.f32 %v558_v2, %v290_v9  ;;  %v292_v22 = vmul.f32 %v536_v0, %v275_v16  ;;  %v320_v23 = vld [vmem:[%s547_s30 + $0x20] sm:$0xff]  ;;  %v308_v26 = vadd.f32 %v558_v2, %v291_v14  ;;  %v321_v29 = vld [vmem:[%s547_s30 + $0x28] sm:$0xff] }
  0x15   : > { %v350_v20 = vadd.f32 %v563_v3, %v333_v8  ;;  %v351_v25 = vadd.f32 %v563_v3, %v334_v13  ;;  %v352_v27 = vadd.f32 %v563_v3, %v335_v15  ;;  %v336_v28 = vmul.f32 %v541_v1, %v319_v17  ;;  %v278_v38 = vld [vmem:[%s553_s9 + $0x30] sm:$0xff]  ;;  %v279_v44 = vld [vmem:[%s553_s9 + $0x38] sm:$0xff]  ;;  %v280_v46 = vld [vmem:[%s553_s9 + $0x40] sm:$0xff] }
  0x16   : > { %v309_v31 = vadd.f32 %v558_v2, %v292_v22  ;;  %v293_v32 = vmul.f32 %v536_v0, %v276_v18  ;;  %v337_v33 = vmul.f32 %v541_v1, %v320_v23  ;;  %v294_v37 = vmul.f32 %v536_v0, %v277_v24  ;;  %v322_v39 = vld [vmem:[%s547_s30 + $0x30] sm:$0xff]  ;;  %v323_v45 = vld [vmem:[%s547_s30 + $0x38] sm:$0xff]  ;;  %v324_v55 = vld [vmem:[%s547_s30 + $0x40] sm:$0xff] }
  0x17   : > { %v360_v30 = vadd.f32 %v350_v20, %v306_v19  ;;  %v361_v34 = vadd.f32 %v351_v25, %v307_v21  ;;  %v362_v35 = vadd.f32 %v352_v27, %v308_v26  ;;  %v353_v36 = vadd.f32 %v563_v3, %v336_v28  ;;  %v281_v60 = vld [vmem:[%s553_s9 + $0x48] sm:$0xff] }
  0x18   : > { %v310_v41 = vadd.f32 %v558_v2, %v293_v32  ;;  %v354_v42 = vadd.f32 %v563_v3, %v337_v33  ;;  %v338_v43 = vmul.f32 %v541_v1, %v321_v29  ;;  %v311_v50 = vadd.f32 %v558_v2, %v294_v37  ;;  %v325_v61 = vld [vmem:[%s547_s30 + $0x48] sm:$0xff] }
  0x19   : > { %v370_v40 = vmax.f32 %v360_v30, 0.0  ;;  %v371_v47 = vmax.f32 %v361_v34, 0.0  ;;  %v372_v48 = vmax.f32 %v362_v35, 0.0  ;;  %v363_v49 = vadd.f32 %v353_v36, %v309_v31 }
  0x1a   : > { %v364_v51 = vadd.f32 %v354_v42, %v310_v41  ;;  %v355_v52 = vadd.f32 %v563_v3, %v338_v43  ;;  %v295_v53 = vmul.f32 %v536_v0, %v278_v38  ;;  %v339_v54 = vmul.f32 %v541_v1, %v322_v39 }
  0x1b   : > { %380 = vst [vmem:[%s598_s16] sm:$0xff] %v370_v40  ;;  %381 = vst [vmem:[%s598_s16 + $0x8] sm:$0xff] %v371_v47  ;;  %v373_v56 = vmax.f32 %v363_v49, 0.0  ;;  %v296_v57 = vmul.f32 %v536_v0, %v279_v44  ;;  %v340_v58 = vmul.f32 %v541_v1, %v323_v45  ;;  %v297_v59 = vmul.f32 %v536_v0, %v280_v46 }
  0x1c   : > { %382 = vst [vmem:[%s598_s16 + $0x10] sm:$0xff] %v372_v48  ;;  %v374_v62 = vmax.f32 %v364_v51, 0.0  ;;  %v365_v63 = vadd.f32 %v355_v52, %v311_v50  ;;  %v312_v4 = vadd.f32 %v558_v2, %v295_v53  ;;  %v356_v5 = vadd.f32 %v563_v3, %v339_v54 }
  0x1d   : > { %383 = vst [vmem:[%s598_s16 + $0x18] sm:$0xff] %v373_v56  ;;  %v313_v6 = vadd.f32 %v558_v2, %v296_v57  ;;  %v357_v7 = vadd.f32 %v563_v3, %v340_v58  ;;  %v314_v8 = vadd.f32 %v558_v2, %v297_v59  ;;  %v341_v9 = vmul.f32 %v541_v1, %v324_v55 }
  0x1e   : > { %384 = vst [vmem:[%s598_s16 + $0x20] sm:$0xff] %v374_v62  ;;  %v375_v10 = vmax.f32 %v365_v63, 0.0  ;;  %v366_v11 = vadd.f32 %v356_v5, %v312_v4  ;;  %v298_v12 = vmul.f32 %v536_v0, %v281_v60  ;;  %v342_v13 = vmul.f32 %v541_v1, %v325_v61 }
  0x1f   : > { %v367_v14 = vadd.f32 %v357_v7, %v313_v6  ;;  %v358_v15 = vadd.f32 %v563_v3, %v341_v9 }
  0x20   : > { %385 = vst [vmem:[%s598_s16 + $0x28] sm:$0xff] %v375_v10  ;;  %v376_v16 = vmax.f32 %v366_v11, 0.0  ;;  %v315_v17 = vadd.f32 %v558_v2, %v298_v12  ;;  %v359_v18 = vadd.f32 %v563_v3, %v342_v13 }
  0x21   : > { %v377_v19 = vmax.f32 %v367_v14, 0.0  ;;  %v368_v20 = vadd.f32 %v358_v15, %v314_v8 }
  0x22   : > { %386 = vst [vmem:[%s598_s16 + $0x30] sm:$0xff] %v376_v16  ;;  %v369_v21 = vadd.f32 %v359_v18, %v315_v17 }
  0x23   : > { %387 = vst [vmem:[%s598_s16 + $0x38] sm:$0xff] %v377_v19  ;;  %v378_v22 = vmax.f32 %v368_v20, 0.0 }
  0x24   : > { %v379_v23 = vmax.f32 %v369_v21, 0.0 }
  0x25   : > { %388 = vst [vmem:[%s598_s16 + $0x40] sm:$0xff] %v378_v22 }
  0x26   : > { %389 = vst [vmem:[%s598_s16 + $0x48] sm:$0xff] %v379_v23 }
  0x27 PF: > { %s16_s21 = sadd.s32 1, %s486_s21  }
  0x28   : > { %p13_p4 = scmp.ge.s32.totalorder %s16_s21, 4  }
  0x2a   :  { %15 = sbr.rel (!%p13_p4) target bundleno = 1 (0x1), region = 77 }

// kernel: resblock_forward.4
= control target key start
LH: loop header
LB: loop body
LE: loop exit
PB: predicated region body
PF: predicated region fallthrough
CT: control target
= control target key end

     0   :  { %s3772_s25 = smov 0   ;;  %s4891_s0 = inlined_call_operand.vmem [shape: f32[2,104,128], index: 0, kind: input, shape index: {}]   ;;  %s4892_s1 = inlined_call_operand.vmem [shape: f32[1,128], index: 1, kind: input, shape index: {}]   ;;  %s4893_s2 = inlined_call_operand.vmem [shape: f32[1,128], index: 2, kind: input, shape index: {}]   ;;  %s4894_s3 = inlined_call_operand.vmem [shape: f32[104,1], index: 3, kind: input, shape index: {}]   ;;  %s4895_s4 = inlined_call_operand.vmem [shape: f32[80,1], index: 4, kind: input, shape index: {}]   ;;  %s4896_s5 = inlined_call_operand.vmem [shape: f32[1152,128], index: 5, kind: input, shape index: {}]   ;;  %s4897_s6 = inlined_call_operand.vmem [shape: f32[2,80,128], index: 6, kind: input, shape index: {}]   ;;  %s4898_s7 = inlined_call_operand.vmem [shape: f32[128,128], index: 7, kind: input, shape index: {}]   ;;  %s4899_s8 = inlined_call_operand.vmem [shape: f32[2,80,128], index: 8, kind: output, shape index: {0}]   ;;  %s4900_s9 = inlined_call_operand.vmem [shape: f32[2,80,128], index: 9, kind: output, shape index: {1}]   ;;  %s4901_s10 = inlined_call_operand.vmem [shape: f32[1,128], index: 10, kind: output, shape index: {2}]   ;;  %s4902_s11 = inlined_call_operand.vmem [shape: f32[1,128], index: 11, kind: output, shape index: {3}]   ;;  %s4903_s12 = inlined_call_operand.vmem [shape: f32[1,128], index: 12, kind: output, shape index: {4}]   ;;  %s4904_s13 = inlined_call_operand.vmem [shape: f32[1,128], index: 13, kind: output, shape index: {5}]  }
   0x1 LB: > { %s2534_s26 = sadd.s32 4294967295, %s3698_s25   ;;  %p2538_p0 = scmp.ge.s32.totalorder %s3698_s25, 1  ;;  %s3698_s25 = sphi %s3772_s25, %s24_s25  }
   0x2   : > { %p388_p1 = scmp.lt.s32.totalorder %s3698_s25, 3 }
   0x4   : > { %p389_p2 = pnand %p2538_p0, %p388_p1 }
   0x5   : > { %p442_p3 = scmp.lt.s32.totalorder (!%p389_p2), %s2534_s26, 1  ;;  %p2543_p4 = scmp.ne.s32.totalorder (!%p389_p2), %s2534_s26, 0 }
   0x6   : > { %392 = sbr.rel (%p389_p2) target bundleno = 546 (0x222), region = 52 }
   0xd   : > { %s443_s27 = scalar_select %p442_p3, %s2534_s26, 1 }
   0xe   : > { %465 = sbr.rel (%p2543_p4) target bundleno = 21 (0x15), region = 56  ;;  %v3700_v0 = vmov (!%p2543_p4), 0.0  }
   0xf   : > { %s3678_s28 = smul.u32 104, %s443_s27  ;;  %466 = vst [vmem:[%s4901_s10] sm:$0x1] (!%p2543_p4), %v3700_v0  ;;  %467 = vst [vmem:[%s4902_s11] sm:$0x1] (!%p2543_p4), %v3700_v0 }
  0x10   : > { %s3679_s29 = smul.u32 80, %s443_s27  ;;  %468 = vst [vmem:[%s4903_s12] sm:$0x1] (!%p2543_p4), %v3700_v0  ;;  %469 = vst [vmem:[%s4904_s13] sm:$0x1] (!%p2543_p4), %v3700_v0 }
  0x11   : > { %s3783_s15 = scalar_lea.vmem %s4891_s0, %s3678_s28 }
  0x12   : > { %s3788_s18 = scalar_lea.vmem %s4897_s6, %s3679_s29  ;;  %s3793_s21 = scalar_lea.vmem %s4899_s8, %s3679_s29 }
  0x13   : > { %s3798_s24 = scalar_lea.vmem %s4900_s9, %s3679_s29 }
  0x15 PF: > { %v539_v1 = vld [vmem:[%s4894_s3 + $0x18] sm:$0xff]  ;;  %v537_v2 = vld [vmem:[%s4894_s3 + $0x8] sm:$0xff]  ;;  %v3701_v3 = vmov 0   ;;  %v538_v4 = vld [vmem:[%s4894_s3 + $0x10] sm:$0xff]  ;;  %vm670_vm0 = vcmask 1046528   ;;  %vm1266_vm1 = vcmask 1044480  }
  0x16   : > { %3691 = vset.pattern.permute.xlu1 %v3701_v3  ;;  %3690 = vset.pattern.permute.xlu0 %v3701_v3  ;;  %v536_v5 = vld [vmem:[%s4894_s3] sm:$0xff]  ;;  %v541_v7 = vld [vmem:[%s4894_s3 + $0x28] sm:$0xff]  ;;  %v542_v12 = vld [vmem:[%s4894_s3 + $0x30] sm:$0xff]  ;;  %vm1439_vm2 = vcmask 1043456   ;;  %vm948_vm3 = vcmask 1045504   ;;  %vm1757_vm4 = vcmask 1042432  }
  0x17   : > { %566 = vperm.xlu1 %3691, %v539_v1   ;;  %556 = vperm.xlu0 %3690, %v537_v2   ;;  %v540_v6 = vld [vmem:[%s4894_s3 + $0x20] sm:$0xff]  ;;  %v644_v9 = vld [vmem:[%s4896_s5 + $0x88] sm:$0xff]  ;;  %v645_v15 = vld [vmem:[%s4896_s5 + $0x90] sm:$0xff]  ;;  %vm1930_vm5 = vcmask 1041408  }
  0x18   : > { %v643_v8 = vld [vmem:[%s4896_s5 + $0x80] sm:$0xff]  ;;  %v1251_v11 = vld [vmem:[%s4896_s5 + $0x208] sm:$0xff]  ;;  %v646_v16 = vld [vmem:[%s4896_s5 + $0x98] sm:$0xff] }
  0x19   : > { %v1250_v10 = vld [vmem:[%s4896_s5 + $0x200] sm:$0xff]  ;;  %v3278_v13 = vpack.c.bf16 %v644_v9, %v643_v8  ;;  %v1252_v17 = vld [vmem:[%s4896_s5 + $0x210] sm:$0xff]  ;;  %v3282_v18 = vpack.c.bf16 %v646_v16, %v645_v15  ;;  %v1253_v19 = vld [vmem:[%s4896_s5 + $0x218] sm:$0xff] }
  0x1a   : > { %v3406_v14 = vpack.c.bf16 %v1251_v11, %v1250_v10  ;;  %v647_v20 = vld [vmem:[%s4896_s5 + $0xa0] sm:$0xff]  ;;  %v648_v21 = vld [vmem:[%s4896_s5 + $0xa8] sm:$0xff]  ;;  %v543_v22 = vld [vmem:[%s4894_s3 + $0x38] sm:$0xff]  ;;  %v3410_v23 = vpack.c.bf16 %v1253_v19, %v1252_v17 }
  0x1b   : > { %561 = vperm.xlu0 %3690, %v538_v4   ;;  %551 = vperm.xlu1 %3691, %v536_v5   ;;  %v1254_v24 = vld [vmem:[%s4896_s5 + $0x220] sm:$0xff]  ;;  %v1255_v25 = vld [vmem:[%s4896_s5 + $0x228] sm:$0xff]  ;;  %v3286_v26 = vpack.c.bf16 %v648_v21, %v647_v20  ;;  %v649_v28 = vld [vmem:[%s4896_s5 + $0xb0] sm:$0xff] }
  0x1c   : > { %3279 = vmatprep.subr.bf16.mxu1 %v3278_v13  ;;  %3407 = vmatprep.subr.bf16.mxu0 %v3406_v14  ;;  %v3414_v27 = vpack.c.bf16 %v1255_v25, %v1254_v24  ;;  %v650_v29 = vld [vmem:[%s4896_s5 + $0xb8] sm:$0xff]  ;;  %v1256_v30 = vld [vmem:[%s4896_s5 + $0x230] sm:$0xff]  ;;  %v544_v32 = vld [vmem:[%s4894_s3 + $0x40] sm:$0xff] }
  0x1d   : > { %3281 = vmatpush3.bf16.msra.mxu1 %v3278_v13  ;;  %3409 = vmatpush3.bf16.msra.mxu0 %v3406_v14  ;;  %v1257_v31 = vld [vmem:[%s4896_s5 + $0x238] sm:$0xff]  ;;  %v545_v33 = vld [vmem:[%s4894_s3 + $0x48] sm:$0xff]  ;;  %v3290_v34 = vpack.c.bf16 %v650_v29, %v649_v28  ;;  %v651_v36 = vld [vmem:[%s4896_s5 + $0xc0] sm:$0xff] }
  0x1e   : > { %3283 = vmatprep.subr.bf16.mxu1 %v3282_v18  ;;  %3411 = vmatprep.subr.bf16.mxu0 %v3410_v23  ;;  %v3418_v35 = vpack.c.bf16 %v1257_v31, %v1256_v30  ;;  %v652_v37 = vld [vmem:[%s4896_s5 + $0xc8] sm:$0xff]  ;;  %v1258_v38 = vld [vmem:[%s4896_s5 + $0x240] sm:$0xff]  ;;  %v546_v40 = vld [vmem:[%s4894_s3 + $0x50] sm:$0xff] }
  0x1f   : > { %571 = vperm.xlu0 %3690, %v540_v6   ;;  %576 = vperm.xlu1 %3691, %v541_v7   ;;  %v1259_v39 = vld [vmem:[%s4896_s5 + $0x248] sm:$0xff]  ;;  %v547_v41 = vld [vmem:[%s4894_s3 + $0x58] sm:$0xff]  ;;  %v3294_v42 = vpack.c.bf16 %v652_v37, %v651_v36  ;;  %v653_v44 = vld [vmem:[%s4896_s5 + $0xd0] sm:$0xff] }
  0x20   : > { %v3422_v43 = vpack.c.bf16 %v1259_v39, %v1258_v38  ;;  %v654_v45 = vld [vmem:[%s4896_s5 + $0xd8] sm:$0xff]  ;;  %v1260_v46 = vld [vmem:[%s4896_s5 + $0x250] sm:$0xff]  ;;  %v548_v48 = vld [vmem:[%s4894_s3 + $0x60] sm:$0xff] }
  0x21   : > { %3285 = vmatpush3.bf16.msra.mxu1 %v3282_v18  ;;  %3413 = vmatpush3.bf16.msra.mxu0 %v3410_v23  ;;  %v1261_v47 = vld [vmem:[%s4896_s5 + $0x258] sm:$0xff]  ;;  %v2097_v49 = vld [vmem:[%s4895_s4] sm:$0xff]  ;;  %v3298_v50 = vpack.c.bf16 %v654_v45, %v653_v44  ;;  %v656_v53 = vld [vmem:[%s4896_s5 + $0xe8] sm:$0xff] }
  0x22   : > { %3287 = vmatprep.subr.bf16.mxu1 %v3286_v26  ;;  %3415 = vmatprep.subr.bf16.mxu0 %v3414_v27  ;;  %v3426_v51 = vpack.c.bf16 %v1261_v47, %v1260_v46  ;;  %v655_v52 = vld [vmem:[%s4896_s5 + $0xe0] sm:$0xff]  ;;  %v1263_v55 = vld [vmem:[%s4896_s5 + $0x268] sm:$0xff]  ;;  %v2099_v57 = vld [vmem:[%s4895_s4 + $0x10] sm:$0xff] }
  0x23   : > { %581 = vperm.xlu0 %3690, %v542_v12   ;;  %586 = vperm.xlu1 %3691, %v543_v22   ;;  %v1262_v54 = vld [vmem:[%s4896_s5 + $0x260] sm:$0xff]  ;;  %v2098_v56 = vld [vmem:[%s4895_s4 + $0x8] sm:$0xff]  ;;  %v3302_v60 = vpack.c.bf16 %v656_v53, %v655_v52  ;;  %v657_v62 = vld [vmem:[%s4896_s5 + $0xf0] sm:$0xff] }
  0x24   : > { %v482_v58 = vld [vmem:[%s3783_s15 + $0x60] sm:$0xff]  ;;  %v3430_v61 = vpack.c.bf16 %v1263_v55, %v1262_v54  ;;  %v658_v63 = vld [vmem:[%s4896_s5 + $0xf8] sm:$0xff]  ;;  %v1264_v0 = vld [vmem:[%s4896_s5 + $0x270] sm:$0xff] }
  0x25   : > { %3289 = vmatpush3.bf16.msra.mxu1 %v3286_v26  ;;  %3417 = vmatpush3.bf16.msra.mxu0 %v3414_v27  ;;  %v3948_v59 = vld [vmem:[%s4892_s1] ss:$0 sm:$0xff]  ;;  %v1265_v1 = vld [vmem:[%s4896_s5 + $0x278] sm:$0xff]  ;;  %v3306_v7 = vpack.c.bf16 %v658_v63, %v657_v62  ;;  %v628_v10 = vld [vmem:[%s4896_s5 + $0x8] sm:$0xff] }
  0x26   : > { %3291 = vmatprep.subr.bf16.mxu1 %v3290_v34  ;;  %3419 = vmatprep.subr.bf16.mxu0 %v3418_v35  ;;  %v502_v2 = vmul.f32 %v3948_v59, %v482_v58  ;;  %v2100_v3 = vld [vmem:[%s4895_s4 + $0x18] sm:$0xff]  ;;  %v2101_v4 = vld [vmem:[%s4895_s4 + $0x20] sm:$0xff]  ;;  %v3434_v8 = vpack.c.bf16 %v1265_v1, %v1264_v0  ;;  %v1424_v12 = vld [vmem:[%s4896_s5 + $0x288] sm:$0xff] }
  0x27   : > { %591 = vperm.xlu0 %3690, %v544_v32   ;;  %596 = vperm.xlu1 %3691, %v545_v33   ;;  %v3972_v5 = vld [vmem:[%s4893_s2] ss:$0 sm:$0xff]  ;;  %v2102_v13 = vld [vmem:[%s4895_s4 + $0x28] sm:$0xff]  ;;  %v2103_v14 = vld [vmem:[%s4895_s4 + $0x30] sm:$0xff] }
  0x28   : > { %v3975_v6 = vadd.f32 %v3972_v5, %v502_v2  ;;  %v627_v9 = vld [vmem:[%s4896_s5] sm:$0xff]  ;;  %v2104_v17 = vld [vmem:[%s4895_s4 + $0x38] sm:$0xff]  ;;  %v2106_v19 = vld [vmem:[%s4895_s4 + $0x48] sm:$0xff] }
  0x29   : > { %3293 = vmatpush3.bf16.msra.mxu1 %v3290_v34  ;;  %3421 = vmatpush3.bf16.msra.mxu0 %v3418_v35  ;;  %v1423_v11 = vld [vmem:[%s4896_s5 + $0x280] sm:$0xff]  ;;  %v3995_v15 = vpack.c.bf16 %v628_v10, %v627_v9  ;;  %v473_v20 = vld [vmem:[%s3783_s15 + $0x18] sm:$0xff]  ;;  %v471_v21 = vld [vmem:[%s3783_s15 + $0x8] sm:$0xff] }
  0x2a   : > { %3295 = vmatprep.subr.bf16.mxu1 %v3294_v42  ;;  %3423 = vmatprep.subr.bf16.mxu0 %v3422_v43  ;;  %v3997_v16 = vpack.c.bf16 %v1424_v12, %v1423_v11  ;;  %v2105_v18 = vld [vmem:[%s4895_s4 + $0x40] sm:$0xff]  ;;  %v493_v22 = vmul.f32 %v3948_v59, %v473_v20  ;;  %v491_v23 = vmul.f32 %v3948_v59, %v471_v21  ;;  %v472_v24 = vld [vmem:[%s3783_s15 + $0x10] sm:$0xff]  ;;  %v475_v27 = vld [vmem:[%s3783_s15 + $0x28] sm:$0xff] }
  0x2b   : > { %601 = vperm.xlu0 %3690, %v546_v40   ;;  %606 = vperm.xlu1 %3691, %v547_v41   ;;  %v470_v25 = vld [vmem:[%s3783_s15] sm:$0xff]  ;;  %v476_v28 = vld [vmem:[%s3783_s15 + $0x30] sm:$0xff]  ;;  %v492_v29 = vmul.f32 %v3948_v59, %v472_v24  ;;  %v477_v33 = vld [vmem:[%s3783_s15 + $0x38] sm:$0xff]  ;;  %v495_v35 = vmul.f32 %v3948_v59, %v475_v27 }
  0x2c   : > { %v474_v26 = vld [vmem:[%s3783_s15 + $0x20] sm:$0xff]  ;;  %v490_v30 = vmul.f32 %v3948_v59, %v470_v25  ;;  %v513_v31 = vadd.f32 %v3972_v5, %v493_v22  ;;  %v511_v32 = vadd.f32 %v3972_v5, %v491_v23  ;;  %v496_v36 = vmul.f32 %v3948_v59, %v476_v28  ;;  %v632_v54 = vld [vmem:[%s4896_s5 + $0x28] sm:$0xff]  ;;  %v480_v62 = vld [vmem:[%s3783_s15 + $0x50] sm:$0xff] }
  0x2d   : > { %3297 = vmatpush3.bf16.msra.mxu1 %v3294_v42  ;;  %3425 = vmatpush3.bf16.msra.mxu0 %v3422_v43  ;;  %v494_v34 = vmul.f32 %v3948_v59, %v474_v26  ;;  %v512_v37 = vadd.f32 %v3972_v5, %v492_v29  ;;  %v497_v39 = vmul.f32 %v3948_v59, %v477_v33  ;;  %v629_v42 = vld [vmem:[%s4896_s5 + $0x10] sm:$0xff]  ;;  %v630_v43 = vld [vmem:[%s4896_s5 + $0x18] sm:$0xff]  ;;  %v478_v44 = vld [vmem:[%s3783_s15 + $0x40] sm:$0xff] }
  0x2e   : > { %3299 = vmatprep.subr.bf16.mxu1 %v3298_v50  ;;  %3427 = vmatprep.subr.bf16.mxu0 %v3426_v51  ;;  %v510_v38 = vadd.f32 %v3972_v5, %v490_v30  ;;  %v526_v40 = vmax.f32 %v513_v31, 0.0  ;;  %v524_v41 = vmax.f32 %v511_v32, 0.0  ;;  %v515_v46 = vadd.f32 %v3972_v5, %v495_v35  ;;  %v631_v53 = vld [vmem:[%s4896_s5 + $0x20] sm:$0xff]  ;;  %v481_v63 = vld [vmem:[%s3783_s15 + $0x58] sm:$0xff]  ;;  %v633_v10 = vld [vmem:[%s4896_s5 + $0x30] sm:$0xff] }
  0x2f   : > { %611 = vperm.xlu0 %3690, %v548_v48   ;;  %2109 = vperm.xlu1 %3691, %v2097_v49   ;;  %v514_v45 = vadd.f32 %v3972_v5, %v494_v34  ;;  %v4040_v47 = vadd.f32 %v3972_v5, %v496_v36  ;;  %v1425_v48 = vld [vmem:[%s4896_s5 + $0x290] sm:$0xff]  ;;  %v1426_v49 = vld [vmem:[%s4896_s5 + $0x298] sm:$0xff]  ;;  %v1427_v55 = vld [vmem:[%s4896_s5 + $0x2a0] sm:$0xff]  ;;  %v4059_v58 = vadd.f32 %v3972_v5, %v497_v39 }
  0x30   : > { %v4071_v2 = vpack.c.bf16 %v630_v43, %v629_v42  ;;  %v4075_v9 = vpack.c.bf16 %v1426_v49, %v1425_v48  ;;  %v634_v11 = vld [vmem:[%s4896_s5 + $0x38] sm:$0xff]  ;;  %v1429_v24 = vld [vmem:[%s4896_s5 + $0x2b0] sm:$0xff]  ;;  %v635_v33 = vld [vmem:[%s4896_s5 + $0x40] sm:$0xff] }
  0x31   : > { %3301 = vmatpush3.bf16.msra.mxu1 %v3298_v50  ;;  %3429 = vmatpush3.bf16.msra.mxu0 %v3426_v51  ;;  %v479_v50 = vld [vmem:[%s3783_s15 + $0x48] sm:$0xff]  ;;  %v530_v22 = vmax.f32 %v4059_v58, 0.0  ;;  %v1430_v25 = vld [vmem:[%s4896_s5 + $0x2b8] sm:$0xff]  ;;  %v4108_v28 = vpack.c.bf16 %v634_v11, %v633_v10  ;;  %v637_v43 = vld [vmem:[%s4896_s5 + $0x50] sm:$0xff] }
  0x32   : > { %3303 = vmatprep.subr.bf16.mxu1 %v3302_v60  ;;  %3431 = vmatprep.subr.bf16.mxu0 %v3430_v61  ;;  %v636_v34 = vld [vmem:[%s4896_s5 + $0x48] sm:$0xff]  ;;  %v638_v48 = vld [vmem:[%s4896_s5 + $0x58] sm:$0xff]  ;;  %v1433_v49 = vld [vmem:[%s4896_s5 + $0x2d0] sm:$0xff] }
  0x33   : > { %2114 = vperm.xlu0 %3690, %v2098_v56   ;;  %2119 = vperm.xlu1 %3691, %v2099_v57   ;;  %v525_v56 = vmax.f32 %v512_v37, 0.0  ;;  %v523_v57 = vmax.f32 %v510_v38, 0.0  ;;  %v1432_v42 = vld [vmem:[%s4896_s5 + $0x2c8] sm:$0xff]  ;;  %v1435_v11 = vld [vmem:[%s4896_s5 + $0x2e0] sm:$0xff] }
  0x35   : > { %3305 = vmatpush3.bf16.msra.mxu1 %v3302_v60  ;;  %3433 = vmatpush3.bf16.msra.mxu0 %v3430_v61  ;;  %v498_v60 = vmul.f32 %v3948_v59, %v478_v44  ;;  %v1428_v61 = vld [vmem:[%s4896_s5 + $0x2a8] sm:$0xff] }
  0x36   : > { %3307 = vmatprep.subr.bf16.mxu1 %v3306_v7  ;;  %3435 = vmatprep.subr.bf16.mxu0 %v3434_v8 }
  0x37   : > { %2124 = vperm.xlu0 %3690, %v2100_v3   ;;  %2129 = vperm.xlu1 %3691, %v2101_v4   ;;  %v499_v3 = vmul.f32 %v3948_v59, %v479_v50  ;;  %v527_v4 = vmax.f32 %v514_v45, 0.0  ;;  %v4095_v23 = vadd.f32 %v3972_v5, %v498_v60  ;;  %v1434_v50 = vld [vmem:[%s4896_s5 + $0x2d8] sm:$0xff]  ;;  %v639_v60 = vld [vmem:[%s4896_s5 + $0x60] sm:$0xff] }
  0x38   : > { %v4175_v10 = vpack.c.bf16 %v1434_v50, %v1433_v49  ;;  %v535_v49 = vmax.f32 %v3975_v6, 0.0 }
  0x39   : > { %3309 = vmatpush3.bf16.msra.mxu1 %v3306_v7  ;;  %3437 = vmatpush3.bf16.msra.mxu0 %v3434_v8  ;;  %v528_v7 = vmax.f32 %v515_v46, 0.0  ;;  %v529_v8 = vmax.f32 %v4040_v47, 0.0  ;;  %v4106_v27 = vadd.f32 %v3972_v5, %v499_v3  ;;  %v1438_v47 = vld [vmem:[%s4896_s5 + $0x2f8] sm:$0xff] }
  0x3a   : > { %3311 = vmatprep.subr.bf16.mxu1 %v3995_v15  ;;  %3439 = vmatprep.subr.bf16.mxu0 %v3997_v16 }
  0x3b   : > { %2134 = vperm.xlu0 %3690, %v2102_v13   ;;  %2139 = vperm.xlu1 %3691, %v2103_v14   ;;  %v4083_v14 = vpack.c.bf16 %v632_v54, %v631_v53  ;;  %v531_v53 = vmax.f32 %v4095_v23, 0.0  ;;  %v4156_v54 = vpack.c.bf16 %v636_v34, %v635_v33  ;;  %v642_v23 = vld [vmem:[%s4896_s5 + $0x78] sm:$0xff] }
  0x3f   : > { %2144 = vperm.xlu0 %3690, %v2104_v17   ;;  %2149 = vperm.xlu1 %3691, %v2105_v18   ;;  %v4085_v17 = vpack.c.bf16 %v1428_v61, %v1427_v55  ;;  %v500_v18 = vmul.f32 %v3948_v59, %v480_v62  ;;  %v640_v61 = vld [vmem:[%s4896_s5 + $0x68] sm:$0xff] }
  0x41   : > { %v4122_v38 = vadd.f32 %v3972_v5, %v500_v18 }
  0x43   : > { %2154 = vperm.xlu0 %3690, %v2106_v19   ;;  %v501_v19 = vmul.f32 %v3948_v59, %v481_v63 }
  0x45   : > { %v4125_v39 = vadd.f32 %v3972_v5, %v501_v19  ;;  %v532_v19 = vmax.f32 %v4106_v27, 0.0 }
  0x96   : > { %v567_v51 = vpop.permute.xlu1 %566  ;;  %v557_v52 = vpop.permute.xlu0 %556 }
  0x97   : > { %v4067_v0 = vmul.f32 %v567_v51, %v526_v40  ;;  %v4069_v1 = vmul.f32 %v557_v52, %v524_v41  ;;  %v4127_v40 = vpack.c.bf16 %v1430_v25, %v1429_v24  ;;  %v1431_v41 = vld [vmem:[%s4896_s5 + $0x2c0] sm:$0xff]  ;;  %v1437_v24 = vld [vmem:[%s4896_s5 + $0x2f0] sm:$0xff]  ;;  %v533_v25 = vmax.f32 %v4122_v38, 0.0 }
  0x98   : > { %v4161_v58 = vpack.c.bf16 %v1432_v42, %v1431_v41  ;;  %v4227_v38 = vpack.c.bf16 %v1438_v47, %v1437_v24  ;;  %v1596_v41 = vld [vmem:[%s4896_s5 + $0x300] sm:$0xff] }
  0x99   : > { %v672_v26 = vrot.slane %v4069_v1, 1  ;;  %v1270_v59 = vrot.slane %v4067_v0, 3  ;;  %v1267_v30 = vrot.slane %v4069_v1, 3  ;;  %v676_v37 = vrot.slane %v4067_v0, 1 }
  0x9a   : > { %v562_v12 = vpop.permute.xlu0 %561  ;;  %v552_v13 = vpop.permute.xlu1 %551 }
  0x9b   : > { %v4089_v20 = vmul.f32 %v562_v12, %v525_v56  ;;  %v4091_v21 = vmul.f32 %v552_v13, %v523_v57 }
  0x9d   : > { %v671_v29 = vrot.slane %v4091_v21, 1  ;;  %v1268_v31 = vrot.slane %v4089_v20, 3  ;;  %v674_v32 = vrot.slane %v4089_v20, 1 }
  0x9e   : > { %v572_v35 = vpop.permute.xlu0 %571  ;;  %v577_v36 = vpop.permute.xlu1 %576 }
  0x9f   : > { %v4138_v44 = vmul.f32 %v572_v35, %v527_v4  ;;  %v4140_v45 = vmul.f32 %v577_v36, %v528_v7  ;;  %v673_v5 = vsel %vm670_vm0, %v671_v29, %v672_v26  ;;  %v1269_v46 = vsel %vm1266_vm1, %v1267_v30, %v1268_v31 }
  0xa0   : > { %2840 = vmatprep.mubr.f32.mxu1 %v673_v5  ;;  %3028 = vmatprep.mubr.f32.mxu0 %v1269_v46  ;;  %v675_v51 = vsel %vm670_vm0, %v672_v26, %v674_v32  ;;  %v1271_v52 = vsel %vm1266_vm1, %v1268_v31, %v1270_v59  ;;  %v677_v3 = vsel %vm670_vm0, %v674_v32, %v676_v37  ;;  %v932_v31 = vld [vmem:[%s4896_s5 + $0x100] sm:$0xff]  ;;  %v933_v32 = vld [vmem:[%s4896_s5 + $0x108] sm:$0xff]  ;;  %v534_v5 = vmax.f32 %v4125_v39, 0.0 }
  0xa1   : > { %2841 = vmatmul.mubr.f32.vlgmr.msra.gmra.mrb[0].mxu1 %v675_v51  ;;  %3029 = vmatmul.mubr.f32.vlgmr.msra.gmra.mrb[0].mxu0 %v1271_v52  ;;  %v1272_v55 = vrot.slane %v4138_v44, 3  ;;  %v678_v56 = vrot.slane %v4138_v44, 1  ;;  %v1274_v57 = vrot.slane %v4140_v45, 3  ;;  %v680_v4 = vrot.slane %v4140_v45, 1 }
  0xa2   : > { %3313 = vmatpush3.bf16.msra.mxu1 %v3995_v15  ;;  %3441 = vmatpush3.bf16.msra.mxu0 %v3997_v16  ;;  %v582_v62 = vpop.permute.xlu0 %581  ;;  %v587_v63 = vpop.permute.xlu1 %586  ;;  %v4173_v7 = vpack.c.bf16 %v638_v48, %v637_v43  ;;  %v1436_v15 = vld [vmem:[%s4896_s5 + $0x2e8] sm:$0xff]  ;;  %v641_v16 = vld [vmem:[%s4896_s5 + $0x70] sm:$0xff]  ;;  %v4208_v26 = vpack.c.bf16 %v640_v61, %v639_v60  ;;  %v4246_v50 = vpack.c.bf16 %v933_v32, %v932_v31  ;;  %v1440_v60 = vrot.slane %v4069_v1, 4 }
  0xa3   : > { %v4188_v12 = vmul.f32 %v582_v62, %v529_v8  ;;  %v4190_v13 = vmul.f32 %v587_v63, %v530_v22  ;;  %2843 = vmatprep.mubr.f32.mxu1 %v677_v3  ;;  %3315 = vmatprep.subr.bf16.mxu1 %v4071_v2  ;;  %v1273_v18 = vsel %vm1266_vm1, %v1270_v59, %v1272_v55  ;;  %v954_v61 = vrot.slane %v4067_v0, 2 }
  0xa4   : > { %3031 = vmatprep.mubr.f32.mxu0 %v1273_v18  ;;  %3443 = vmatprep.subr.bf16.mxu0 %v4075_v9  ;;  %v679_v8 = vsel %vm670_vm0, %v676_v37, %v678_v56  ;;  %v1275_v22 = vsel %vm1266_vm1, %v1272_v55, %v1274_v57  ;;  %v4213_v30 = vpack.c.bf16 %v1436_v15, %v1435_v11  ;;  %v1441_v11 = vrot.slane %v4089_v20, 4 }
  0xa5   : > { %2844 = vmatmul.mubr.f32.gmra.mrb[2].mxu1 %v679_v8  ;;  %3032 = vmatmul.mubr.f32.gmra.mrb[2].mxu0 %v1275_v22  ;;  %v1276_v59 = vrot.slane %v4188_v12, 3  ;;  %v682_v27 = vrot.slane %v4188_v12, 1  ;;  %v1278_v29 = vrot.slane %v4190_v13, 3  ;;  %v681_v35 = vsel %vm670_vm0, %v678_v56, %v680_v4 }
  0xa6   : > { %3317 = vmatpush3.bf16.msra.mxu1 %v4071_v2  ;;  %3445 = vmatpush3.bf16.msra.mxu0 %v4075_v9  ;;  %v592_v33 = vpop.permute.xlu0 %591  ;;  %v597_v34 = vpop.permute.xlu1 %596  ;;  %v684_v36 = vrot.slane %v4190_v13, 1  ;;  %v4225_v37 = vpack.c.bf16 %v642_v23, %v641_v16  ;;  %v1597_v2 = vld [vmem:[%s4896_s5 + $0x308] sm:$0xff]  ;;  %v1932_v15 = vrot.slane %v4067_v0, 6  ;;  %v952_v23 = vrot.slane %v4089_v20, 2 }
  0xa7   : > { %v4235_v9 = vmul.f32 %v592_v33, %v531_v53  ;;  %v4237_v42 = vmul.f32 %v597_v34, %v532_v19  ;;  %2846 = vmatprep.mubr.f32.mxu1 %v681_v35  ;;  %3319 = vmatprep.subr.bf16.mxu1 %v4083_v14  ;;  %v1277_v43 = vsel %vm1266_vm1, %v1274_v57, %v1276_v59  ;;  %v956_v8 = vrot.slane %v4138_v44, 2 }
  0xa8   : > { %3034 = vmatprep.mubr.f32.mxu0 %v1277_v43  ;;  %3447 = vmatprep.subr.bf16.mxu0 %v4085_v17  ;;  %v683_v46 = vsel %vm670_vm0, %v680_v4, %v682_v27  ;;  %v1279_v48 = vsel %vm1266_vm1, %v1276_v59, %v1278_v29  ;;  %v4251_v53 = vpack.c.bf16 %v1597_v2, %v1596_v41  ;;  %v958_v22 = vrot.slane %v4140_v45, 2 }
  0xa9   : > { %2847 = vmatmul.mubr.f32.gmra.mrb[4].mxu1 %v683_v46  ;;  %3035 = vmatmul.mubr.f32.gmra.mrb[4].mxu0 %v1279_v48  ;;  %v1280_v51 = vrot.slane %v4235_v9, 3  ;;  %v686_v52 = vrot.slane %v4235_v9, 1  ;;  %v1282_v39 = vrot.slane %v4237_v42, 3  ;;  %v685_v6 = vsel %vm670_vm0, %v682_v27, %v684_v36 }
  0xaa   : > { %3321 = vmatpush3.bf16.msra.mxu1 %v4083_v14  ;;  %3449 = vmatpush3.bf16.msra.mxu0 %v4085_v17  ;;  %v602_v55 = vpop.permute.xlu0 %601  ;;  %v607_v56 = vpop.permute.xlu1 %606  ;;  %v688_v57 = vrot.slane %v4237_v42, 1  ;;  %v1759_v17 = vrot.slane %v4067_v0, 5  ;;  %v966_v32 = vrot.slane %v4237_v42, 2  ;;  %v1442_v34 = vsel %vm1439_vm2, %v1440_v60, %v1441_v11 }
  0xab   : > { %v4259_v62 = vmul.f32 %v602_v55, %v533_v25  ;;  %v4261_v63 = vmul.f32 %v607_v56, %v534_v5  ;;  %2849 = vmatprep.mubr.f32.mxu1 %v685_v6  ;;  %3323 = vmatprep.subr.bf16.mxu1 %v4108_v28  ;;  %v1281_v14 = vsel %vm1266_vm1, %v1278_v29, %v1280_v51  ;;  %v960_v25 = vrot.slane %v4188_v12, 2 }
  0xac   : > { %3037 = vmatprep.mubr.f32.mxu0 %v1281_v14  ;;  %3451 = vmatprep.subr.bf16.mxu0 %v4127_v40  ;;  %v687_v3 = vsel %vm670_vm0, %v684_v36, %v686_v52  ;;  %v1283_v4 = vsel %vm1266_vm1, %v1280_v51, %v1282_v39  ;;  %v689_v47 = vsel %vm670_vm0, %v686_v52, %v688_v57  ;;  %v1758_v35 = vrot.slane %v4089_v20, 5 }
  0xad   : > { %2850 = vmatmul.mubr.f32.gmra.mrb[6].mxu1 %v687_v3  ;;  %3038 = vmatmul.mubr.f32.gmra.mrb[6].mxu0 %v1283_v4  ;;  %v1284_v16 = vrot.slane %v4259_v62, 3  ;;  %v690_v18 = vrot.slane %v4259_v62, 1  ;;  %v1286_v19 = vrot.slane %v4261_v63, 3  ;;  %v968_v33 = vrot.slane %v4259_v62, 2 }
  0xae   : > { %3325 = vmatpush3.bf16.msra.mxu1 %v4108_v28  ;;  %3453 = vmatpush3.bf16.msra.mxu0 %v4127_v40  ;;  %v612_v24 = vpop.permute.xlu0 %611  ;;  %v962_v28 = vrot.slane %v4190_v13, 2  ;;  %v964_v40 = vrot.slane %v4235_v9, 2  ;;  %v1761_v36 = vrot.slane %v4138_v44, 5  ;;  %v1931_v41 = vrot.slane %v4089_v20, 6 }
  0xaf   : > { %2852 = vmatprep.mubr.f32.mxu1 %v689_v47  ;;  %3327 = vmatprep.subr.bf16.mxu1 %v4156_v54  ;;  %v1285_v59 = vsel %vm1266_vm1, %v1282_v39, %v1284_v16  ;;  %v691_v27 = vsel %vm670_vm0, %v688_v57, %v690_v18  ;;  %v4286_v29 = vmul.f32 %v612_v24, %v535_v49  ;;  %v1763_v46 = vrot.slane %v4140_v45, 5 }
  0xb0   : > { %3040 = vmatprep.mubr.f32.mxu0 %v1285_v59  ;;  %3455 = vmatprep.subr.bf16.mxu0 %v4161_v58  ;;  %v1287_v31 = vsel %vm1266_vm1, %v1284_v16, %v1286_v19  ;;  %v4303_v2 = vsel %vm948_vm3, %v952_v23, %v954_v61  ;;  %v4306_v43 = vsel %vm948_vm3, %v954_v61, %v956_v8  ;;  %v1765_v49 = vrot.slane %v4188_v12, 5 }
  0xb1   : > { %2853 = vmatmul.mubr.f32.gmra.mrb[8].mxu1 %v691_v27  ;;  %3041 = vmatmul.mubr.f32.gmra.mrb[8].mxu0 %v1287_v31  ;;  %v4309_v5 = vsel %vm948_vm3, %v956_v8, %v958_v22  ;;  %v4320_v48 = vsel %vm948_vm3, %v962_v28, %v964_v40  ;;  %v1777_v51 = vrot.slane %v4286_v29, 5  ;;  %v4327_v52 = vsel %vm948_vm3, %v964_v40, %v966_v32 }
  0xb2   : > { %3329 = vmatpush3.bf16.msra.mxu1 %v4156_v54  ;;  %3457 = vmatpush3.bf16.msra.mxu0 %v4161_v58  ;;  %v4314_v54 = vsel %vm948_vm3, %v958_v22, %v960_v25  ;;  %v4317_v58 = vsel %vm948_vm3, %v960_v25, %v962_v28  ;;  %v4330_v39 = vsel %vm948_vm3, %v966_v32, %v968_v33  ;;  %v1767_v55 = vrot.slane %v4190_v13, 5 }
  0xb3   : > { %2887 = vmatprep.mubr.f32.mxu1 %v4091_v21  ;;  %3075 = vmatprep.mubr.f32.mxu0 %v1442_v34  ;;  %v4334_v56 = vsel %vm1757_vm4, %v1758_v35, %v1759_v17  ;;  %v4337_v6 = vsel %vm1757_vm4, %v1759_v17, %v1761_v36  ;;  %v4340_v57 = vsel %vm1757_vm4, %v1761_v36, %v1763_v46  ;;  %v1769_v14 = vrot.slane %v4235_v9, 5  ;;  %v934_v34 = vld [vmem:[%s4896_s5 + $0x110] sm:$0xff] }
  0xb4   : > { %3331 = vmatprep.subr.bf16.mxu1 %v4173_v7  ;;  %3459 = vmatprep.subr.bf16.mxu0 %v4175_v10  ;;  %v4343_v60 = vsel %vm1757_vm4, %v1763_v46, %v1765_v49  ;;  %v4348_v61 = vsel %vm1757_vm4, %v1765_v49, %v1767_v55  ;;  %v1771_v3 = vrot.slane %v4237_v42, 5  ;;  %v1773_v17 = vrot.slane %v4259_v62, 5  ;;  %v935_v46 = vld [vmem:[%s4896_s5 + $0x118] sm:$0xff]  ;;  %v1598_v49 = vld [vmem:[%s4896_s5 + $0x310] sm:$0xff] }
  0xb5   : > { %v1443_v4 = vrot.slane %v4067_v0, 4  ;;  %v1775_v16 = vrot.slane %v4261_v63, 5  ;;  %v1950_v18 = vrot.slane %v4286_v29, 6  ;;  %v4365_v19 = vsel %vm1757_vm4, %v1767_v55, %v1769_v14 }
  0xb6   : > { %3333 = vmatpush3.bf16.msra.mxu1 %v4173_v7  ;;  %3461 = vmatpush3.bf16.msra.mxu0 %v4175_v10  ;;  %v1122_v7 = vrot.slane %v4261_v63, 2  ;;  %v4361_v10 = vsel %vm1930_vm5, %v1931_v41, %v1932_v15  ;;  %v4368_v24 = vsel %vm1757_vm4, %v1769_v14, %v1771_v3  ;;  %v4371_v47 = vsel %vm1757_vm4, %v1771_v3, %v1773_v17 }
  0xb7   : > { %3335 = vmatprep.subr.bf16.mxu1 %v4208_v26  ;;  %3463 = vmatprep.subr.bf16.mxu0 %v4213_v30  ;;  %v4374_v8 = vsel %vm1757_vm4, %v1773_v17, %v1775_v16  ;;  %v4380_v25 = vsel %vm1757_vm4, %v1775_v16, %v1777_v51  ;;  %v1934_v59 = vrot.slane %v4138_v44, 6  ;;  %v1936_v27 = vrot.slane %v4140_v45, 6  ;;  %v1599_v51 = vld [vmem:[%s4896_s5 + $0x318] sm:$0xff] }
  0xb8   : > { %v4377_v22 = vsel %vm948_vm3, %v968_v33, %v1122_v7  ;;  %v1938_v28 = vrot.slane %v4188_v12, 6  ;;  %v1940_v40 = vrot.slane %v4190_v13, 6  ;;  %v1942_v31 = vrot.slane %v4235_v9, 6 }
  0xb9   : > { %v4394_v32 = vsel %vm1930_vm5, %v1932_v15, %v1934_v59  ;;  %v1948_v33 = vrot.slane %v4261_v63, 6  ;;  %v4403_v35 = vsel %vm1930_vm5, %v1934_v59, %v1936_v27  ;;  %v1445_v16 = vrot.slane %v4138_v44, 4 }
  0xba   : > { %3337 = vmatpush3.bf16.msra.mxu1 %v4208_v26  ;;  %3465 = vmatpush3.bf16.msra.mxu0 %v4213_v30  ;;  %v1944_v26 = vrot.slane %v4237_v42, 6  ;;  %v1946_v30 = vrot.slane %v4259_v62, 6  ;;  %v4406_v36 = vsel %vm1930_vm5, %v1936_v27, %v1938_v28  ;;  %v4409_v41 = vsel %vm1930_vm5, %v1938_v28, %v1940_v40  ;;  %v1601_v28 = vld [vmem:[%s4896_s5 + $0x328] sm:$0xff] }
  0xbb   : > { %3339 = vmatprep.subr.bf16.mxu1 %v4225_v37  ;;  %3467 = vmatprep.subr.bf16.mxu0 %v4227_v38  ;;  %v4412_v15 = vsel %vm1930_vm5, %v1940_v40, %v1942_v31  ;;  %v4433_v17 = vsel %vm1930_vm5, %v1948_v33, %v1950_v18  ;;  %v4443_v7 = vsel %vm1439_vm2, %v1441_v11, %v1443_v4  ;;  %v1447_v27 = vrot.slane %v4140_v45, 4  ;;  %v1600_v11 = vld [vmem:[%s4896_s5 + $0x320] sm:$0xff] }
  0xbc   : > { %v4424_v55 = vsel %vm1930_vm5, %v1942_v31, %v1944_v26  ;;  %v4427_v14 = vsel %vm1930_vm5, %v1944_v26, %v1946_v30  ;;  %v4430_v3 = vsel %vm1930_vm5, %v1946_v30, %v1948_v33  ;;  %v3346_v59 = vpack.c.bf16 %v935_v46, %v934_v34  ;;  %v1603_v46 = vld [vmem:[%s4896_s5 + $0x338] sm:$0xff] }
  0xbd   : > { %v3474_v18 = vpack.c.bf16 %v1599_v51, %v1598_v49  ;;  %v4463_v40 = vsel %vm1439_vm2, %v1443_v4, %v1445_v16  ;;  %v1449_v31 = vrot.slane %v4188_v12, 4  ;;  %v4469_v26 = vsel %vm1439_vm2, %v1445_v16, %v1447_v27  ;;  %v1602_v4 = vld [vmem:[%s4896_s5 + $0x330] sm:$0xff] }
  0xbe   : > { %3341 = vmatpush3.bf16.msra.mxu1 %v4225_v37  ;;  %3469 = vmatpush3.bf16.msra.mxu0 %v4227_v38  ;;  %v936_v37 = vld [vmem:[%s4896_s5 + $0x120] sm:$0xff]  ;;  %v937_v38 = vld [vmem:[%s4896_s5 + $0x128] sm:$0xff]  ;;  %v1451_v33 = vrot.slane %v4190_v13, 4  ;;  %v3478_v34 = vpack.c.bf16 %v1601_v28, %v1600_v11 }
  0xbf   : > { %3343 = vmatprep.subr.bf16.mxu1 %v4246_v50  ;;  %3471 = vmatprep.subr.bf16.mxu0 %v4251_v53  ;;  %v3350_v30 = vpack.c.bf16 %v937_v38, %v936_v37  ;;  %v4488_v49 = vsel %vm1439_vm2, %v1447_v27, %v1449_v31  ;;  %v1455_v37 = vrot.slane %v4237_v42, 4  ;;  %v3482_v38 = vpack.c.bf16 %v1603_v46, %v1602_v4  ;;  %v1604_v27 = vld [vmem:[%s4896_s5 + $0x340] sm:$0xff] }
  0xc0   : > { %v4493_v51 = vsel %vm1439_vm2, %v1449_v31, %v1451_v33 }
  0xc1   : > { %2888 = vmatmul.mubr.f32.vlgmr.msra.gmra.mrb[0].mxu1 %v4069_v1  ;;  %3076 = vmatmul.mubr.f32.vlgmr.msra.gmra.mrb[0].mxu0 %v4443_v7 }
  0xc2   : > { %2890 = vmatprep.mubr.f32.mxu1 %v4089_v20  ;;  %3345 = vmatpush3.bf16.msra.mxu1 %v4246_v50  ;;  %v938_v50 = vld [vmem:[%s4896_s5 + $0x130] sm:$0xff]  ;;  %v1745_v20 = vld [vmem:[%s4896_s5 + $0x3a0] sm:$0xff] }
  0xc3   : > { %3078 = vmatprep.mubr.f32.mxu0 %v4463_v40  ;;  %3473 = vmatpush3.bf16.msra.mxu0 %v4251_v53  ;;  %v939_v53 = vld [vmem:[%s4896_s5 + $0x138] sm:$0xff] }
  0xc4   : > { %3347 = vmatprep.subr.bf16.mxu1 %v3346_v59  ;;  %3475 = vmatprep.subr.bf16.mxu0 %v3474_v18  ;;  %v3354_v16 = vpack.c.bf16 %v939_v53, %v938_v50  ;;  %v1459_v50 = vrot.slane %v4261_v63, 4  ;;  %v1754_v63 = vld [vmem:[%s4896_s5 + $0x3e8] sm:$0xff] }
  0xc5   : > { %2891 = vmatmul.mubr.f32.gmra.mrb[2].mxu1 %v4067_v0  ;;  %3079 = vmatmul.mubr.f32.gmra.mrb[2].mxu0 %v4469_v26  ;;  %v1453_v0 = vrot.slane %v4235_v9, 4 }
  0xc6   : > { %2893 = vmatprep.mubr.f32.mxu1 %v4138_v44  ;;  %3349 = vmatpush3.bf16.msra.mxu1 %v3346_v59  ;;  %v940_v44 = vld [vmem:[%s4896_s5 + $0x140] sm:$0xff]  ;;  %v941_v59 = vld [vmem:[%s4896_s5 + $0x148] sm:$0xff] }
  0xc7   : > { %3081 = vmatprep.mubr.f32.mxu0 %v4488_v49  ;;  %3477 = vmatpush3.bf16.msra.mxu0 %v3474_v18  ;;  %v1605_v18 = vld [vmem:[%s4896_s5 + $0x348] sm:$0xff]  ;;  %v4512_v11 = vsel %vm1439_vm2, %v1451_v33, %v1453_v0  ;;  %v4517_v28 = vsel %vm1439_vm2, %v1453_v0, %v1455_v37  ;;  %v3358_v31 = vpack.c.bf16 %v941_v59, %v940_v44  ;;  %v1606_v33 = vld [vmem:[%s4896_s5 + $0x350] sm:$0xff] }
  0xc8   : > { %3351 = vmatprep.subr.bf16.mxu1 %v3350_v30  ;;  %3479 = vmatprep.subr.bf16.mxu0 %v3478_v34  ;;  %v3486_v53 = vpack.c.bf16 %v1605_v18, %v1604_v27  ;;  %v946_v59 = vld [vmem:[%s4896_s5 + $0x170] sm:$0xff]  ;;  %v947_v27 = vld [vmem:[%s4896_s5 + $0x178] sm:$0xff] }
  0xc9   : > { %2894 = vmatmul.mubr.f32.gmra.mrb[4].mxu1 %v4140_v45  ;;  %3082 = vmatmul.mubr.f32.gmra.mrb[4].mxu0 %v4493_v51  ;;  %v1457_v45 = vrot.slane %v4259_v62, 4  ;;  %v943_v62 = vld [vmem:[%s4896_s5 + $0x158] sm:$0xff]  ;;  %v1610_v18 = vld [vmem:[%s4896_s5 + $0x370] sm:$0xff] }
  0xca   : > { %2896 = vmatprep.mubr.f32.mxu1 %v4188_v12  ;;  %3353 = vmatpush3.bf16.msra.mxu1 %v3350_v30  ;;  %v942_v12 = vld [vmem:[%s4896_s5 + $0x150] sm:$0xff]  ;;  %v949_v30 = vrot.slane %v4091_v21, 2 }
  0xcb   : > { %3084 = vmatprep.mubr.f32.mxu0 %v4512_v11  ;;  %3481 = vmatpush3.bf16.msra.mxu0 %v3478_v34  ;;  %v1607_v34 = vld [vmem:[%s4896_s5 + $0x358] sm:$0xff]  ;;  %v4537_v21 = vsel %vm1439_vm2, %v1455_v37, %v1457_v45  ;;  %v4544_v4 = vsel %vm1439_vm2, %v1457_v45, %v1459_v50  ;;  %v3362_v46 = vpack.c.bf16 %v943_v62, %v942_v12  ;;  %v1608_v37 = vld [vmem:[%s4896_s5 + $0x360] sm:$0xff]  ;;  %v1106_v12 = vld [vmem:[%s4896_s5 + $0x188] sm:$0xff] }
  0xcc   : > { %3355 = vmatprep.subr.bf16.mxu1 %v3354_v16  ;;  %3483 = vmatprep.subr.bf16.mxu0 %v3482_v38  ;;  %v3490_v0 = vpack.c.bf16 %v1607_v34, %v1606_v33  ;;  %v3370_v45 = vpack.c.bf16 %v947_v27, %v946_v59  ;;  %v1742_v62 = vld [vmem:[%s4896_s5 + $0x388] sm:$0xff]  ;;  %v1111_v59 = vld [vmem:[%s4896_s5 + $0x1b0] sm:$0xff]  ;;  %v1112_v27 = vld [vmem:[%s4896_s5 + $0x1b8] sm:$0xff] }
  0xcd   : > { %2897 = vmatmul.mubr.f32.gmra.mrb[6].mxu1 %v4190_v13  ;;  %3085 = vmatmul.mubr.f32.gmra.mrb[6].mxu0 %v4517_v28  ;;  %v950_v13 = vrot.slane %v4069_v1, 2 }
  0xce   : > { %2899 = vmatprep.mubr.f32.mxu1 %v4235_v9  ;;  %3357 = vmatpush3.bf16.msra.mxu1 %v3354_v16  ;;  %v944_v9 = vld [vmem:[%s4896_s5 + $0x160] sm:$0xff]  ;;  %v945_v16 = vld [vmem:[%s4896_s5 + $0x168] sm:$0xff] }
  0xcf   : > { %3087 = vmatprep.mubr.f32.mxu0 %v4537_v21  ;;  %3485 = vmatpush3.bf16.msra.mxu0 %v3482_v38  ;;  %v951_v1 = vsel %vm948_vm3, %v949_v30, %v950_v13  ;;  %v1609_v38 = vld [vmem:[%s4896_s5 + $0x368] sm:$0xff]  ;;  %v3366_v44 = vpack.c.bf16 %v945_v16, %v944_v9  ;;  %v1741_v30 = vld [vmem:[%s4896_s5 + $0x380] sm:$0xff]  ;;  %v1743_v9 = vld [vmem:[%s4896_s5 + $0x390] sm:$0xff] }
  0xd0   : > { %3359 = vmatprep.subr.bf16.mxu1 %v3358_v31  ;;  %3487 = vmatprep.subr.bf16.mxu0 %v3486_v53  ;;  %v3502_v34 = vpack.c.bf16 %v1742_v62, %v1741_v30  ;;  %v1744_v16 = vld [vmem:[%s4896_s5 + $0x398] sm:$0xff]  ;;  %v1613_v30 = vrot.slane %v4286_v29, 4  ;;  %v1115_v62 = vld [vmem:[%s4896_s5 + $0x1d0] sm:$0xff] }
  0xd1   : > { %2900 = vmatmul.mubr.f32.gmra.mrb[8].mxu1 %v4237_v42  ;;  %3088 = vmatmul.mubr.f32.gmra.mrb[8].mxu0 %v4544_v4  ;;  %v3494_v42 = vpack.c.bf16 %v1609_v38, %v1608_v37  ;;  %v3506_v38 = vpack.c.bf16 %v1744_v16, %v1743_v9  ;;  %v1751_v29 = vld [vmem:[%s4896_s5 + $0x3d0] sm:$0xff]  ;;  %v1118_v9 = vld [vmem:[%s4896_s5 + $0x1e8] sm:$0xff] }
  0xd2   : > { %3361 = vmatpush3.bf16.msra.mxu1 %v3358_v31  ;;  %2934 = vmatprep.mubr.f32.mxu1 %v951_v1  ;;  %v4601_v1 = vsel %vm948_vm3, %v950_v13, %v952_v23  ;;  %v1746_v23 = vld [vmem:[%s4896_s5 + $0x3a8] sm:$0xff] }
  0xd3   : > { %3489 = vmatpush3.bf16.msra.mxu0 %v3486_v53  ;;  %3122 = vmatprep.mubr.f32.mxu0 %v4443_v7  ;;  %v1611_v7 = vld [vmem:[%s4896_s5 + $0x378] sm:$0xff]  ;;  %v1105_v53 = vld [vmem:[%s4896_s5 + $0x180] sm:$0xff] }
  0xd4   : > { %3363 = vmatprep.subr.bf16.mxu1 %v3362_v46  ;;  %3491 = vmatprep.subr.bf16.mxu0 %v3490_v0  ;;  %v3498_v31 = vpack.c.bf16 %v1611_v7, %v1610_v18  ;;  %v3374_v33 = vpack.c.bf16 %v1106_v12, %v1105_v53  ;;  %v1748_v18 = vld [vmem:[%s4896_s5 + $0x3b8] sm:$0xff]  ;;  %v3386_v7 = vpack.c.bf16 %v1112_v27, %v1111_v59  ;;  %v1750_v53 = vld [vmem:[%s4896_s5 + $0x3c8] sm:$0xff] }
  0xd6   : > { %3365 = vmatpush3.bf16.msra.mxu1 %v3362_v46  ;;  %v1107_v46 = vld [vmem:[%s4896_s5 + $0x190] sm:$0xff] }
  0xd7   : > { %3493 = vmatpush3.bf16.msra.mxu0 %v3490_v0  ;;  %3367 = vmatprep.subr.bf16.mxu1 %v3366_v44  ;;  %v1108_v0 = vld [vmem:[%s4896_s5 + $0x198] sm:$0xff] }
  0xd8   : > { %3495 = vmatprep.subr.bf16.mxu0 %v3494_v42  ;;  %v3378_v37 = vpack.c.bf16 %v1108_v0, %v1107_v46  ;;  %v1117_v0 = vld [vmem:[%s4896_s5 + $0x1e0] sm:$0xff] }
  0xda   : > { %3369 = vmatpush3.bf16.msra.mxu1 %v3366_v44  ;;  %v1109_v44 = vld [vmem:[%s4896_s5 + $0x1a0] sm:$0xff] }
  0xdb   : > { %3497 = vmatpush3.bf16.msra.mxu0 %v3494_v42  ;;  %3371 = vmatprep.subr.bf16.mxu1 %v3370_v45  ;;  %v1110_v42 = vld [vmem:[%s4896_s5 + $0x1a8] sm:$0xff] }
  0xdc   : > { %3499 = vmatprep.subr.bf16.mxu0 %v3498_v31  ;;  %v3382_v13 = vpack.c.bf16 %v1110_v42, %v1109_v44 }
  0xde   : > { %3373 = vmatpush3.bf16.msra.mxu1 %v3370_v45  ;;  %v1113_v45 = vld [vmem:[%s4896_s5 + $0x1c0] sm:$0xff] }
  0xdf   : > { %3501 = vmatpush3.bf16.msra.mxu0 %v3498_v31  ;;  %3375 = vmatprep.subr.bf16.mxu1 %v3374_v33  ;;  %v1114_v31 = vld [vmem:[%s4896_s5 + $0x1c8] sm:$0xff] }
  0xe0   : > { %3503 = vmatprep.subr.bf16.mxu0 %v3502_v34  ;;  %v3390_v12 = vpack.c.bf16 %v1114_v31, %v1113_v45 }
  0xe1   : > { %2935 = vmatmul.mubr.f32.vlgmr.msra.gmra.mrb[0].mxu1 %v4601_v1 }
  0xe2   : > { %3123 = vmatmul.mubr.f32.vlgmr.msra.gmra.mrb[0].mxu0 %v4463_v40  ;;  %2937 = vmatprep.mubr.f32.mxu1 %v4303_v2  ;;  %v3510_v40 = vpack.c.bf16 %v1746_v23, %v1745_v20  ;;  %v2223_v20 = vld [vmem:[%s4898_s7] sm:$0xff]  ;;  %v2224_v23 = vld [vmem:[%s4898_s7 + $0x8] sm:$0xff] }
  0xe3   : > { %3377 = vmatpush3.bf16.msra.mxu1 %v3374_v33  ;;  %3125 = vmatprep.mubr.f32.mxu0 %v4469_v26  ;;  %v1747_v26 = vld [vmem:[%s4896_s5 + $0x3b0] sm:$0xff]  ;;  %v1116_v33 = vld [vmem:[%s4896_s5 + $0x1d8] sm:$0xff]  ;;  %v3566_v59 = vpack.c.bf16 %v2224_v23, %v2223_v20 }
  0xe4   : > { %3505 = vmatpush3.bf16.msra.mxu0 %v3502_v34  ;;  %3379 = vmatprep.subr.bf16.mxu1 %v3378_v37  ;;  %v3394_v34 = vpack.c.bf16 %v1116_v33, %v1115_v62  ;;  %v1923_v33 = vld [vmem:[%s4896_s5 + $0x448] sm:$0xff] }
  0xe5   : > { %2938 = vmatmul.mubr.f32.gmra.mrb[2].mxu1 %v4306_v43  ;;  %3507 = vmatprep.subr.bf16.mxu0 %v3506_v38 }
  0xe6   : > { %3126 = vmatmul.mubr.f32.gmra.mrb[2].mxu0 %v4488_v49  ;;  %2940 = vmatprep.mubr.f32.mxu1 %v4309_v5  ;;  %v3514_v49 = vpack.c.bf16 %v1748_v18, %v1747_v26  ;;  %v1916_v26 = vld [vmem:[%s4896_s5 + $0x410] sm:$0xff]  ;;  %v1917_v18 = vld [vmem:[%s4896_s5 + $0x418] sm:$0xff] }
  0xe7   : > { %3381 = vmatpush3.bf16.msra.mxu1 %v3378_v37  ;;  %3128 = vmatprep.mubr.f32.mxu0 %v4493_v51  ;;  %v1749_v51 = vld [vmem:[%s4896_s5 + $0x3c0] sm:$0xff]  ;;  %v1120_v37 = vld [vmem:[%s4896_s5 + $0x1f8] sm:$0xff]  ;;  %v3538_v45 = vpack.c.bf16 %v1917_v18, %v1916_v26 }
  0xe8   : > { %3509 = vmatpush3.bf16.msra.mxu0 %v3506_v38  ;;  %3383 = vmatprep.subr.bf16.mxu1 %v3382_v13  ;;  %v1755_v38 = vld [vmem:[%s4896_s5 + $0x3f0] sm:$0xff] }
  0xe9   : > { %2941 = vmatmul.mubr.f32.gmra.mrb[4].mxu1 %v4314_v54  ;;  %3511 = vmatprep.subr.bf16.mxu0 %v3510_v40 }
  0xea   : > { %3129 = vmatmul.mubr.f32.gmra.mrb[4].mxu0 %v4512_v11  ;;  %2943 = vmatprep.mubr.f32.mxu1 %v4317_v58  ;;  %v3518_v11 = vpack.c.bf16 %v1750_v53, %v1749_v51  ;;  %v1918_v51 = vld [vmem:[%s4896_s5 + $0x420] sm:$0xff]  ;;  %v1919_v53 = vld [vmem:[%s4896_s5 + $0x428] sm:$0xff] }
  0xeb   : > { %3385 = vmatpush3.bf16.msra.mxu1 %v3382_v13  ;;  %3131 = vmatprep.mubr.f32.mxu0 %v4517_v28  ;;  %v1752_v28 = vld [vmem:[%s4896_s5 + $0x3d8] sm:$0xff]  ;;  %v1914_v13 = vld [vmem:[%s4896_s5 + $0x400] sm:$0xff] }
  0xec   : > { %3513 = vmatpush3.bf16.msra.mxu0 %v3510_v40  ;;  %3387 = vmatprep.subr.bf16.mxu1 %v3386_v7  ;;  %v3522_v46 = vpack.c.bf16 %v1752_v28, %v1751_v29  ;;  %v1915_v40 = vld [vmem:[%s4896_s5 + $0x408] sm:$0xff]  ;;  %v1925_v28 = vld [vmem:[%s4896_s5 + $0x458] sm:$0xff] }
  0xed   : > { %2944 = vmatmul.mubr.f32.gmra.mrb[6].mxu1 %v4320_v48  ;;  %3515 = vmatprep.subr.bf16.mxu0 %v3514_v49  ;;  %v3534_v27 = vpack.c.bf16 %v1915_v40, %v1914_v13 }
  0xee   : > { %3132 = vmatmul.mubr.f32.gmra.mrb[6].mxu0 %v4537_v21  ;;  %2946 = vmatprep.mubr.f32.mxu1 %v4327_v52  ;;  %v1614_v21 = vsel %vm1439_vm2, %v1459_v50, %v1613_v30  ;;  %v3398_v50 = vpack.c.bf16 %v1118_v9, %v1117_v0  ;;  %v3542_v30 = vpack.c.bf16 %v1919_v53, %v1918_v51 }
  0xef   : > { %3389 = vmatpush3.bf16.msra.mxu1 %v3386_v7  ;;  %3134 = vmatprep.mubr.f32.mxu0 %v4544_v4  ;;  %v1753_v4 = vld [vmem:[%s4896_s5 + $0x3e0] sm:$0xff]  ;;  %v2225_v7 = vld [vmem:[%s4898_s7 + $0x10] sm:$0xff] }
  0xf0   : > { %3517 = vmatpush3.bf16.msra.mxu0 %v3514_v49  ;;  %3391 = vmatprep.subr.bf16.mxu1 %v3390_v12  ;;  %v3526_v16 = vpack.c.bf16 %v1754_v63, %v1753_v4  ;;  %v2226_v49 = vld [vmem:[%s4898_s7 + $0x18] sm:$0xff]  ;;  %v2237_v63 = vld [vmem:[%s4898_s7 + $0x70] sm:$0xff] }
  0xf1   : > { %2947 = vmatmul.mubr.f32.gmra.mrb[8].mxu1 %v4330_v39  ;;  %3519 = vmatprep.subr.bf16.mxu0 %v3518_v11  ;;  %v3570_v31 = vpack.c.bf16 %v2226_v49, %v2225_v7  ;;  %v1929_v4 = vld [vmem:[%s4896_s5 + $0x478] sm:$0xff] }
  0xf2   : > { %3135 = vmatmul.mubr.f32.gmra.mrb[8].mxu0 %v1614_v21  ;;  %2981 = vmatprep.mubr.f32.mxu1 %v4601_v1  ;;  %v1119_v1 = vld [vmem:[%s4896_s5 + $0x1f0] sm:$0xff] }
  0xf3   : > { %3393 = vmatpush3.bf16.msra.mxu1 %v3390_v12  ;;  %3169 = vmatprep.mubr.f32.mxu0 %v4334_v56  ;;  %v1756_v56 = vld [vmem:[%s4896_s5 + $0x3f8] sm:$0xff]  ;;  %v3402_v44 = vpack.c.bf16 %v1120_v37, %v1119_v1  ;;  %v2227_v12 = vld [vmem:[%s4898_s7 + $0x20] sm:$0xff]  ;;  %v2214_v1 = vld [vmem:[%s3788_s18 + $0x8] sm:$0xff] }
  0xf4   : > { %3521 = vmatpush3.bf16.msra.mxu0 %v3518_v11  ;;  %3395 = vmatprep.subr.bf16.mxu1 %v3394_v34  ;;  %v3530_v42 = vpack.c.bf16 %v1756_v56, %v1755_v38  ;;  %v1921_v11 = vld [vmem:[%s4896_s5 + $0x438] sm:$0xff]  ;;  %v2215_v37 = vld [vmem:[%s3788_s18 + $0x10] sm:$0xff]  ;;  %v2217_v56 = vld [vmem:[%s3788_s18 + $0x20] sm:$0xff] }
  0xf5   : > { %3523 = vmatprep.subr.bf16.mxu0 %v3522_v46  ;;  %v2216_v38 = vld [vmem:[%s3788_s18 + $0x18] sm:$0xff] }
  0xf7   : > { %3397 = vmatpush3.bf16.msra.mxu1 %v3394_v34  ;;  %v2213_v34 = vld [vmem:[%s3788_s18] sm:$0xff] }
  0xf8   : > { %3525 = vmatpush3.bf16.msra.mxu0 %v3522_v46  ;;  %3399 = vmatprep.subr.bf16.mxu1 %v3398_v50  ;;  %v1927_v46 = vld [vmem:[%s4896_s5 + $0x468] sm:$0xff] }
  0xf9   : > { %3527 = vmatprep.subr.bf16.mxu0 %v3526_v16 }
  0xfb   : > { %3401 = vmatpush3.bf16.msra.mxu1 %v3398_v50 }
  0xfc   : > { %3529 = vmatpush3.bf16.msra.mxu0 %v3526_v16  ;;  %3403 = vmatprep.subr.bf16.mxu1 %v3402_v44 }
  0xfd   : > { %3531 = vmatprep.subr.bf16.mxu0 %v3530_v42 }
  0xff   : > { %3405 = vmatpush3.bf16.msra.mxu1 %v3402_v44  ;;  %v2218_v44 = vld [vmem:[%s3788_s18 + $0x28] sm:$0xff] }
 0x100   : > { %3533 = vmatpush3.bf16.msra.mxu0 %v3530_v42  ;;  %3567 = vmatprep.subr.bf16.mxu1 %v3566_v59  ;;  %v2219_v42 = vld [vmem:[%s3788_s18 + $0x30] sm:$0xff] }
 0x101   : > { %3535 = vmatprep.subr.bf16.mxu0 %v3534_v27 }
 0x102   : > { %2982 = vmatmul.mubr.f32.vlgmr.msra.gmra.mrb[0].mxu1 %v4303_v2  ;;  %v2228_v2 = vld [vmem:[%s4898_s7 + $0x28] sm:$0xff] }
 0x103   : > { %3170 = vmatmul.mubr.f32.vlgmr.msra.gmra.mrb[0].mxu0 %v4337_v6  ;;  %2984 = vmatprep.mubr.f32.mxu1 %v4306_v43  ;;  %v3574_v6 = vpack.c.bf16 %v2228_v2, %v2227_v12  ;;  %v1920_v43 = vld [vmem:[%s4896_s5 + $0x430] sm:$0xff] }
 0x104   : > { %3172 = vmatprep.mubr.f32.mxu0 %v4340_v57  ;;  %3537 = vmatpush3.bf16.msra.mxu0 %v3534_v27  ;;  %v2229_v57 = vld [vmem:[%s4898_s7 + $0x30] sm:$0xff]  ;;  %v3546_v62 = vpack.c.bf16 %v1921_v11, %v1920_v43  ;;  %v2110_v27 = vpop.permute.xlu1 %2109 }
 0x105   : > { %3569 = vmatpush3.bf16.msra.mxu1 %v3566_v59  ;;  %3539 = vmatprep.subr.bf16.mxu0 %v3538_v45 }
 0x106   : > { %2985 = vmatmul.mubr.f32.gmra.mrb[2].mxu1 %v4309_v5  ;;  %3571 = vmatprep.subr.bf16.mxu1 %v3570_v31  ;;  %v2230_v5 = vld [vmem:[%s4898_s7 + $0x38] sm:$0xff] }
 0x107   : > { %3173 = vmatmul.mubr.f32.gmra.mrb[2].mxu0 %v4343_v60  ;;  %2987 = vmatprep.mubr.f32.mxu1 %v4314_v54  ;;  %v3578_v60 = vpack.c.bf16 %v2230_v5, %v2229_v57  ;;  %v1922_v54 = vld [vmem:[%s4896_s5 + $0x440] sm:$0xff] }
 0x108   : > { %3175 = vmatprep.mubr.f32.mxu0 %v4348_v61  ;;  %3541 = vmatpush3.bf16.msra.mxu0 %v3538_v45  ;;  %v2231_v61 = vld [vmem:[%s4898_s7 + $0x40] sm:$0xff]  ;;  %v3550_v29 = vpack.c.bf16 %v1923_v33, %v1922_v54  ;;  %v2120_v26 = vpop.permute.xlu1 %2119 }
 0x109   : > { %3573 = vmatpush3.bf16.msra.mxu1 %v3570_v31  ;;  %3543 = vmatprep.subr.bf16.mxu0 %v3542_v30 }
 0x10a   : > { %2988 = vmatmul.mubr.f32.gmra.mrb[4].mxu1 %v4317_v58  ;;  %3575 = vmatprep.subr.bf16.mxu1 %v3574_v6  ;;  %v2232_v58 = vld [vmem:[%s4898_s7 + $0x48] sm:$0xff] }
 0x10b   : > { %3176 = vmatmul.mubr.f32.gmra.mrb[4].mxu0 %v4365_v19  ;;  %2990 = vmatprep.mubr.f32.mxu1 %v4320_v48  ;;  %v3582_v19 = vpack.c.bf16 %v2232_v58, %v2231_v61  ;;  %v1924_v48 = vld [vmem:[%s4896_s5 + $0x450] sm:$0xff] }
 0x10c   : > { %3178 = vmatprep.mubr.f32.mxu0 %v4368_v24  ;;  %3545 = vmatpush3.bf16.msra.mxu0 %v3542_v30  ;;  %v2233_v24 = vld [vmem:[%s4898_s7 + $0x50] sm:$0xff]  ;;  %v3554_v21 = vpack.c.bf16 %v1925_v28, %v1924_v48  ;;  %v2130_v33 = vpop.permute.xlu1 %2129 }
 0x10d   : > { %3577 = vmatpush3.bf16.msra.mxu1 %v3574_v6  ;;  %3547 = vmatprep.subr.bf16.mxu0 %v3546_v62 }
 0x10e   : > { %2991 = vmatmul.mubr.f32.gmra.mrb[6].mxu1 %v4327_v52  ;;  %3579 = vmatprep.subr.bf16.mxu1 %v3578_v60  ;;  %v2234_v52 = vld [vmem:[%s4898_s7 + $0x58] sm:$0xff] }
 0x10f   : > { %3179 = vmatmul.mubr.f32.gmra.mrb[6].mxu0 %v4371_v47  ;;  %2993 = vmatprep.mubr.f32.mxu1 %v4330_v39  ;;  %v3586_v47 = vpack.c.bf16 %v2234_v52, %v2233_v24  ;;  %v1926_v39 = vld [vmem:[%s4896_s5 + $0x460] sm:$0xff] }
 0x110   : > { %3181 = vmatprep.mubr.f32.mxu0 %v4374_v8  ;;  %3549 = vmatpush3.bf16.msra.mxu0 %v3546_v62  ;;  %v2235_v8 = vld [vmem:[%s4898_s7 + $0x60] sm:$0xff]  ;;  %v3558_v0 = vpack.c.bf16 %v1927_v46, %v1926_v39 }
 0x111   : > { %3581 = vmatpush3.bf16.msra.mxu1 %v3578_v60  ;;  %3551 = vmatprep.subr.bf16.mxu0 %v3550_v29 }
 0x112   : > { %2994 = vmatmul.mubr.f32.gmra.mrb[8].mxu1 %v4377_v22  ;;  %3583 = vmatprep.subr.bf16.mxu1 %v3582_v19  ;;  %v2236_v22 = vld [vmem:[%s4898_s7 + $0x68] sm:$0xff] }
 0x113   : > { %3182 = vmatmul.mubr.f32.gmra.mrb[8].mxu0 %v4380_v25  ;;  %3263 = vmatprep.mubr.f32.mxu1 %v2213_v34  ;;  %v3590_v9 = vpack.c.bf16 %v2236_v22, %v2235_v8  ;;  %v1928_v25 = vld [vmem:[%s4896_s5 + $0x470] sm:$0xff] }
 0x114   : > { %3553 = vmatpush3.bf16.msra.mxu0 %v3550_v29  ;;  %3216 = vmatprep.mubr.f32.mxu0 %v4361_v10  ;;  %v2238_v10 = vld [vmem:[%s4898_s7 + $0x78] sm:$0xff]  ;;  %v3562_v50 = vpack.c.bf16 %v1929_v4, %v1928_v25 }
 0x115   : > { %3585 = vmatpush3.bf16.msra.mxu1 %v3582_v19  ;;  %3555 = vmatprep.subr.bf16.mxu0 %v3554_v21  ;;  %v3594_v16 = vpack.c.bf16 %v2238_v10, %v2237_v63 }
 0x116   : > { %3587 = vmatprep.subr.bf16.mxu1 %v3586_v47 }
 0x118   : > { %3557 = vmatpush3.bf16.msra.mxu0 %v3554_v21 }
 0x119   : > { %3589 = vmatpush3.bf16.msra.mxu1 %v3586_v47  ;;  %3559 = vmatprep.subr.bf16.mxu0 %v3558_v0 }
 0x11a   : > { %3591 = vmatprep.subr.bf16.mxu1 %v3590_v9 }
 0x11c   : > { %3561 = vmatpush3.bf16.msra.mxu0 %v3558_v0 }
 0x11d   : > { %3593 = vmatpush3.bf16.msra.mxu1 %v3590_v9  ;;  %3563 = vmatprep.subr.bf16.mxu0 %v3562_v50 }
 0x11e   : > { %3595 = vmatprep.subr.bf16.mxu1 %v3594_v16 }
 0x120   : > { %3565 = vmatpush3.bf16.msra.mxu0 %v3562_v50 }
 0x121   : > { %3597 = vmatpush3.bf16.msra.mxu1 %v3594_v16 }
 0x123   : > { %3217 = vmatmul.mubr.f32.vlgmr.msra.gmra.mrb[0].mxu0 %v4394_v32  ;;  %v2220_v32 = vld [vmem:[%s3788_s18 + $0x38] sm:$0xff] }
 0x124   : > { %3264 = vmatmul.mubr.f32.vlgmr.msra.gmra.mrb[10].mxu1 %v2214_v1  ;;  %3219 = vmatprep.mubr.f32.mxu0 %v4403_v35  ;;  %v2221_v35 = vld [vmem:[%s3788_s18 + $0x40] sm:$0xff] }
 0x125   : > { %3266 = vmatprep.mubr.f32.mxu1 %v2215_v37 }
 0x127   : > { %3220 = vmatmul.mubr.f32.gmra.mrb[2].mxu0 %v4406_v36  ;;  %v2222_v36 = vld [vmem:[%s3788_s18 + $0x48] sm:$0xff] }
 0x128   : > { %3267 = vmatmul.mubr.f32.gmra.mrb[12].mxu1 %v2216_v38  ;;  %3222 = vmatprep.mubr.f32.mxu0 %v4409_v41 }
 0x129   : > { %3269 = vmatprep.mubr.f32.mxu1 %v2217_v56  ;;  %v2140_v56 = vpop.permute.xlu1 %2139 }
 0x12b   : > { %3223 = vmatmul.mubr.f32.gmra.mrb[4].mxu0 %v4412_v15 }
 0x12c   : > { %3270 = vmatmul.mubr.f32.gmra.mrb[14].mxu1 %v2218_v44  ;;  %3225 = vmatprep.mubr.f32.mxu0 %v4424_v55 }
 0x12d   : > { %3272 = vmatprep.mubr.f32.mxu1 %v2219_v42 }
 0x12f   : > { %3226 = vmatmul.mubr.f32.gmra.mrb[6].mxu0 %v4427_v14 }
 0x130   : > { %3273 = vmatmul.mubr.f32.gmra.mrb[16].mxu1 %v2220_v32  ;;  %3228 = vmatprep.mubr.f32.mxu0 %v4430_v3 }
 0x131   : > { %3275 = vmatprep.mubr.f32.mxu1 %v2221_v35 }
 0x133   : > { %3229 = vmatmul.mubr.f32.gmra.mrb[8].mxu0 %v4433_v17  ;;  %v2115_v17 = vpop.permute.xlu0 %2114 }
 0x134   : > { %3276 = vmatmul.mubr.f32.gmra.mrb[18].mxu1 %v2222_v36 }
 0x137   : > { %v2125_v31 = vpop.permute.xlu0 %2124 }
 0x13b   : > { %v2135_v34 = vpop.permute.xlu0 %2134 }
 0x1d5   : > { %v2983_v41 = vpop.f32.mrb[0].mxu1 }
 0x1d6   : > { %v1191_v20 = vpop.f32.mrb[1].mxu1 }
 0x1d9   : > { %v2986_v23 = vpop.f32.mrb[2].mxu1 }
 0x1da   : > { %v1201_v15 = vpop.f32.mrb[3].mxu1 }
 0x1dd   : > { %v2989_v13 = vpop.f32.mrb[4].mxu1 }
 0x1de   : > { %v1211_v55 = vpop.f32.mrb[5].mxu1 }
 0x1e1   : > { %v4832_v40 = vpop.f32.mrb[6].mxu1 }
 0x1e2   : > { %v4834_v59 = vpop.f32.mrb[7].mxu1 }
 0x1e5   : > { %v4836_v14 = vpop.f32.mrb[8].mxu1 }
 0x1e6   : > { %v4838_v3 = vpop.f32.mrb[9].mxu1 }
 0x1f6   : > { %v3218_v18 = vpop.f32.mrb[0].mxu0 }
 0x1f7   : > { %v3598_v7 = vadd.f32 %v3218_v18, %v2983_v41  ;;  %v2028_v49 = vpop.f32.mrb[1].mxu0  ;;  %v3265_v45 = vpop.f32.mrb[10].mxu1 }
 0x1f8   : > { %v3599_v51 = vadd.f32 %v2028_v49, %v1191_v20  ;;  %2355 = vst [vmem:[%s3798_s24 + $0x8] sm:$0xff] %v3265_v45  ;;  %v2384_v53 = vmul.f32 %v3265_v45, %v3265_v45  ;;  %v2305_v12 = vpop.f32.mrb[11].mxu1 }
 0x1f9   : > { %2088 = vst [vmem:[%s3793_s21 + $0x8] sm:$0xff] %v3598_v7  ;;  %v2158_v2 = vmul.f32 %v3598_v7, %v2115_v17  ;;  %2354 = vst [vmem:[%s3798_s24] sm:$0xff] %v2305_v12  ;;  %v2365_v30 = vadd.f32 %v3265_v45, %v2305_v12  ;;  %v2383_v6 = vmul.f32 %v2305_v12, %v2305_v12 }
 0x1fa   : > { %2087 = vst [vmem:[%s3793_s21] sm:$0xff] %v3599_v51  ;;  %v2157_v43 = vmul.f32 %v3599_v51, %v2110_v27  ;;  %v3221_v11 = vpop.f32.mrb[2].mxu0 }
 0x1fb   : > { %v2187_v57 = vmul.f32 %v2158_v2, %v2158_v2  ;;  %v2393_v5 = vadd.f32 %v2384_v53, %v2383_v6  ;;  %v3600_v62 = vadd.f32 %v3221_v11, %v2986_v23  ;;  %v3268_v60 = vpop.f32.mrb[12].mxu1  ;;  %v2038_v54 = vpop.f32.mrb[3].mxu0 }
 0x1fc   : > { %v2168_v61 = vadd.f32 %v2158_v2, %v2157_v43  ;;  %v2186_v58 = vmul.f32 %v2157_v43, %v2157_v43  ;;  %2357 = vst [vmem:[%s3798_s24 + $0x18] sm:$0xff] %v3268_v60  ;;  %v3601_v29 = vadd.f32 %v2038_v54, %v1201_v15  ;;  %v2315_v19 = vpop.f32.mrb[13].mxu1  ;;  %v2386_v28 = vmul.f32 %v3268_v60, %v3268_v60 }
 0x1fd   : > { %2090 = vst [vmem:[%s3793_s21 + $0x18] sm:$0xff] %v3600_v62  ;;  %v2160_v48 = vmul.f32 %v3600_v62, %v2125_v31  ;;  %2356 = vst [vmem:[%s3798_s24 + $0x10] sm:$0xff] %v2315_v19  ;;  %v2366_v24 = vadd.f32 %v2365_v30, %v2315_v19  ;;  %v2385_v52 = vmul.f32 %v2315_v19, %v2315_v19 }
 0x1fe   : > { %v2196_v21 = vadd.f32 %v2187_v57, %v2186_v58  ;;  %2089 = vst [vmem:[%s3793_s21 + $0x10] sm:$0xff] %v3601_v29  ;;  %v2159_v47 = vmul.f32 %v3601_v29, %v2120_v26  ;;  %v3224_v39 = vpop.f32.mrb[4].mxu0 }
 0x1ff   : > { %v2394_v46 = vadd.f32 %v2393_v5, %v2385_v52  ;;  %v3602_v8 = vadd.f32 %v3224_v39, %v2989_v13  ;;  %v3271_v22 = vpop.f32.mrb[14].mxu1  ;;  %v2048_v0 = vpop.f32.mrb[5].mxu0  ;;  %v2367_v9 = vadd.f32 %v3268_v60, %v2366_v24  ;;  %v2189_v25 = vmul.f32 %v2160_v48, %v2160_v48 }
 0x200   : > { %v2169_v4 = vadd.f32 %v2168_v61, %v2159_v47  ;;  %v2188_v63 = vmul.f32 %v2159_v47, %v2159_v47  ;;  %2359 = vst [vmem:[%s3798_s24 + $0x28] sm:$0xff] %v3271_v22  ;;  %v3603_v10 = vadd.f32 %v2048_v0, %v1211_v55  ;;  %v2325_v50 = vpop.f32.mrb[15].mxu1  ;;  %v2388_v42 = vmul.f32 %v3271_v22, %v3271_v22  ;;  %v2145_v55 = vpop.permute.xlu0 %2144 }
 0x201   : > { %2092 = vst [vmem:[%s3793_s21 + $0x28] sm:$0xff] %v3602_v8  ;;  %v2162_v16 = vmul.f32 %v3602_v8, %v2135_v34  ;;  %2358 = vst [vmem:[%s3798_s24 + $0x20] sm:$0xff] %v2325_v50  ;;  %v2368_v1 = vadd.f32 %v2367_v9, %v2325_v50  ;;  %v2387_v37 = vmul.f32 %v2325_v50, %v2325_v50 }
 0x202   : > { %v2395_v38 = vadd.f32 %v2394_v46, %v2386_v28  ;;  %v2197_v44 = vadd.f32 %v2196_v21, %v2188_v63  ;;  %2091 = vst [vmem:[%s3793_s21 + $0x20] sm:$0xff] %v3603_v10  ;;  %v2161_v32 = vmul.f32 %v3603_v10, %v2130_v33  ;;  %v2170_v35 = vadd.f32 %v2169_v4, %v2160_v48  ;;  %v3227_v36 = vpop.f32.mrb[6].mxu0  ;;  %v2150_v33 = vpop.permute.xlu1 %2149 }
 0x203   : > { %v3604_v20 = vadd.f32 %v3227_v36, %v4832_v40  ;;  %v3274_v23 = vpop.f32.mrb[16].mxu1  ;;  %v2058_v15 = vpop.f32.mrb[7].mxu0  ;;  %v2369_v13 = vadd.f32 %v3271_v22, %v2368_v1  ;;  %v2191_v27 = vmul.f32 %v2162_v16, %v2162_v16 }
 0x204   : > { %v2396_v41 = vadd.f32 %v2395_v38, %v2387_v37  ;;  %v2171_v17 = vadd.f32 %v2170_v35, %v2161_v32  ;;  %v2190_v26 = vmul.f32 %v2161_v32, %v2161_v32  ;;  %v2198_v18 = vadd.f32 %v2197_v44, %v2189_v25  ;;  %2361 = vst [vmem:[%s3798_s24 + $0x38] sm:$0xff] %v3274_v23  ;;  %v2335_v7 = vpop.f32.mrb[17].mxu1  ;;  %v2155_v48 = vpop.permute.xlu0 %2154 }
 0x205   : > { %2094 = vst [vmem:[%s3793_s21 + $0x38] sm:$0xff] %v3604_v20  ;;  %v2164_v49 = vmul.f32 %v3604_v20, %v2145_v55  ;;  %v3605_v45 = vadd.f32 %v2058_v15, %v4834_v59  ;;  %2360 = vst [vmem:[%s3798_s24 + $0x30] sm:$0xff] %v2335_v7  ;;  %v2370_v31 = vadd.f32 %v2369_v13, %v2335_v7  ;;  %v2364_v20 = vld [vmem:[%s4903_s12] sm:$0x1] }
 0x206   : > { %v2389_v51 = vmul.f32 %v2335_v7, %v2335_v7  ;;  %v2199_v40 = vadd.f32 %v2198_v18, %v2190_v26  ;;  %v2390_v53 = vmul.f32 %v3274_v23, %v3274_v23  ;;  %v2172_v12 = vadd.f32 %v2171_v17, %v2162_v16  ;;  %v3230_v30 = vpop.f32.mrb[8].mxu0  ;;  %v2382_v7 = vld [vmem:[%s4904_s13] sm:$0x1] }
 0x207   : > { %v2397_v2 = vadd.f32 %v2396_v41, %v2388_v42  ;;  %2093 = vst [vmem:[%s3793_s21 + $0x30] sm:$0xff] %v3605_v45  ;;  %v2163_v6 = vmul.f32 %v3605_v45, %v2140_v56  ;;  %v3606_v43 = vadd.f32 %v3230_v30, %v4836_v14  ;;  %v3277_v11 = vpop.f32.mrb[18].mxu1  ;;  %v2068_v57 = vpop.f32.mrb[9].mxu0  ;;  %v2371_v5 = vadd.f32 %v3274_v23, %v2370_v31 }
 0x208   : > { %v2200_v59 = vadd.f32 %v2199_v40, %v2191_v27  ;;  %2363 = vst [vmem:[%s3798_s24 + $0x48] sm:$0xff] %v3277_v11  ;;  %v3607_v60 = vadd.f32 %v2068_v57, %v4838_v3  ;;  %v2345_v54 = vpop.f32.mrb[19].mxu1  ;;  %v2193_v61 = vmul.f32 %v2164_v49, %v2164_v49  ;;  %v2392_v28 = vmul.f32 %v3277_v11, %v3277_v11  ;;  %v2185_v40 = vld [vmem:[%s4902_s11] sm:$0x1] }
 0x209   : > { %v2398_v62 = vadd.f32 %v2397_v2, %v2389_v51  ;;  %v2173_v58 = vadd.f32 %v2172_v12, %v2163_v6  ;;  %v2192_v29 = vmul.f32 %v2163_v6, %v2163_v6  ;;  %2096 = vst [vmem:[%s3793_s21 + $0x48] sm:$0xff] %v3606_v43  ;;  %2362 = vst [vmem:[%s3798_s24 + $0x40] sm:$0xff] %v2345_v54 }
 0x20a   : > { %v2372_v19 = vadd.f32 %v2371_v5, %v2345_v54  ;;  %2095 = vst [vmem:[%s3793_s21 + $0x40] sm:$0xff] %v3607_v60  ;;  %v2165_v14 = vmul.f32 %v3607_v60, %v2150_v33  ;;  %v2391_v24 = vmul.f32 %v2345_v54, %v2345_v54  ;;  %v2166_v21 = vmul.f32 %v3606_v43, %v2155_v48 }
 0x20b   : > { %v2399_v52 = vadd.f32 %v2398_v62, %v2390_v53  ;;  %v2201_v34 = vadd.f32 %v2200_v59, %v2192_v29  ;;  %v2174_v47 = vadd.f32 %v2173_v58, %v2164_v49  ;;  %v2167_v49 = vld [vmem:[%s4901_s10] sm:$0x1] }
 0x20c   : > { %v2373_v39 = vadd.f32 %v3277_v11, %v2372_v19  ;;  %v2194_v46 = vmul.f32 %v2165_v14, %v2165_v14  ;;  %v2195_v25 = vmul.f32 %v2166_v21, %v2166_v21 }
 0x20d   : > { %v2400_v3 = vadd.f32 %v2399_v52, %v2391_v24  ;;  %v2175_v8 = vadd.f32 %v2174_v47, %v2165_v14  ;;  %v2202_v22 = vadd.f32 %v2201_v34, %v2193_v61 }
 0x20e   : > { %v2374_v0 = vrot.slane %v2373_v39, 4 }
 0x20f   : > { %v2401_v9 = vadd.f32 %v2400_v3, %v2392_v28  ;;  %v2176_v4 = vadd.f32 %v2175_v8, %v2166_v21  ;;  %v2203_v63 = vadd.f32 %v2202_v22, %v2194_v46 }
 0x210   : > { %v2375_v10 = vadd.f32 %v2374_v0, %v2373_v39 }
 0x211   : > { %v2402_v50 = vrot.slane %v2401_v9, 4  ;;  %v2177_v16 = vrot.slane %v2176_v4, 4  ;;  %v2204_v1 = vadd.f32 %v2203_v63, %v2195_v25 }
 0x212   : > { %v2376_v37 = vrot.slane %v2375_v10, 2 }
 0x213   : > { %v2403_v38 = vadd.f32 %v2402_v50, %v2401_v9  ;;  %v2178_v56 = vadd.f32 %v2177_v16, %v2176_v4  ;;  %v2205_v44 = vrot.slane %v2204_v1, 4 }
 0x214   : > { %v2377_v42 = vadd.f32 %v2376_v37, %v2375_v10 }
 0x215   : > { %v2404_v32 = vrot.slane %v2403_v38, 2  ;;  %v2179_v35 = vrot.slane %v2178_v56, 2  ;;  %v2206_v36 = vadd.f32 %v2205_v44, %v2204_v1 }
 0x216   : > { %v2378_v41 = vrot.slane %v2377_v42, 1 }
 0x217   : > { %v2405_v23 = vadd.f32 %v2404_v32, %v2403_v38  ;;  %v2180_v15 = vadd.f32 %v2179_v35, %v2178_v56  ;;  %v2207_v13 = vrot.slane %v2206_v36, 2 }
 0x218   : > { %v2379_v55 = vadd.f32 %v2378_v41, %v2377_v42 }
 0x219   : > { %v2406_v27 = vrot.slane %v2405_v23, 1  ;;  %v2181_v17 = vrot.slane %v2180_v15, 1  ;;  %v2208_v26 = vadd.f32 %v2207_v13, %v2206_v36 }
 0x21a   : > { %v2380_v18 = vadd.f32 %v2379_v55, %v2364_v20 }
 0x21b   : > { %v2407_v45 = vadd.f32 %v2406_v27, %v2405_v23  ;;  %v2182_v31 = vadd.f32 %v2181_v17, %v2180_v15  ;;  %v2209_v51 = vrot.slane %v2208_v26, 1 }
 0x21c   : > { %2381 = vst [vmem:[%s4903_s12] sm:$0x1] %v2380_v18 }
 0x21d   : > { %v2408_v53 = vadd.f32 %v2407_v45, %v2382_v7  ;;  %v2183_v12 = vadd.f32 %v2182_v31, %v2167_v49  ;;  %v2210_v2 = vadd.f32 %v2209_v51, %v2208_v26 }
 0x21f   : > { %2409 = vst [vmem:[%s4904_s13] sm:$0x1] %v2408_v53  ;;  %2184 = vst [vmem:[%s4901_s10] sm:$0x1] %v2183_v12  ;;  %v2211_v30 = vadd.f32 %v2210_v2, %v2185_v40 }
 0x221   : > { %2212 = vst [vmem:[%s4902_s11] sm:$0x1] %v2211_v30 }
 0x222 PF: > { %s24_s25 = sadd.s32 1, %s3698_s25  }
 0x223   : > { %p21_p5 = scmp.ge.s32.totalorder %s24_s25, 4  }
 0x225   :  { %23 = sbr.rel (!%p21_p5) target bundleno = 1 (0x1), region = 133 }

</bundles_post_ra>
